<compile_context>
chip_gen: v6e
topology: v6e:2x2x1
jax: 0.10.0
libtpu: 0.0.40
codegen_flags: <defaults>
</compile_context>

<pallas_src>
import functools

import jax
import jax.numpy as jnp
import numpy as np
from jax.experimental import pallas as pl
from jax.experimental.pallas import tpu as pltpu


def _prelu(x, a):
    # nn.PReLU with a single shared parameter `a`
    return jnp.where(x >= 0, x, a * x)


def lstm_hist_kernel(B, T, S, L, n_layers,
                     hist_ref, cond_ref, alphas_ref,
                     w1_ref, b1_ref, w2_ref, b2_ref,
                     w3g_ref, bg0_ref,
                     wihp_ref, whhp_ref, blstm_ref,
                     freqs_ref,
                     wa1_ref, ba1_ref, wa2_ref, ba2_ref, wa3_ref, ba3_ref,
                     out_ref, gx_scr):
    f32 = jnp.float32
    bf16 = jnp.bfloat16
    L4 = 4 * L

    def bdot(act, w):
        # bf16 MXU operands, f32 accumulation
        return jnp.dot(act.astype(bf16), w, preferred_element_type=f32)

    a1 = alphas_ref[0]
    a2 = alphas_ref[1]
    aa1 = alphas_ref[2]
    aa2 = alphas_ref[3]

    # ---- state encoder MLP (first two Linears); the 3rd Linear is folded ----
    # ---- into layer-0's LSTM input projection on the host (w3g / bg0).   ----
    h = _prelu(bdot(hist_ref[...], w1_ref[...]) + b1_ref[...], a1)
    h = _prelu(bdot(h, w2_ref[...]) + b2_ref[...], a2)          # (T*B, 2L)

    # ---- fused sigmoid/tanh lane masks (hoisted; PyTorch gate order i,f,g,o)
    lane = jax.lax.broadcasted_iota(jnp.int32, (B, L4), 1)
    is_g = jnp.logical_and(lane >= 2 * L, lane < 3 * L)
    g_scale = jnp.where(is_g, jnp.float32(1.0), jnp.float32(0.5))   # (B, 4L)
    g_add = jnp.where(is_g, jnp.float32(0.0), jnp.float32(0.5))     # (B, 4L)

    # ---- stacked LSTM, packed-lane recurrence --------------------------------
    xs_packed = None          # packed (T*B, 4L) inputs for layers >= 1
    h_packed = None
    for layer in range(n_layers):
        if layer == 0:
            # folded encoder-Linear + layer-0 input projection + folded biases
            gates_x = bdot(h, w3g_ref[...]) + bg0_ref[...]            # (T*B,4L)
        else:
            # padded W_ih (zero rows outside [L:2L)) unpacks h for free
            gates_x = bdot(xs_packed, wihp_ref[layer]) + blstm_ref[layer]
        # Stage time-major gates in an aligned (T, B, 4L) scratch: the per-step
        # read in the recurrence is a plain leading-index load; the 2-row
        # sublane extracts below happen once, off the recurrent critical path.
        for t in range(T):
            gx_scr[t] = gates_x[t * B:(t + 1) * B, :]

        whh_l = whhp_ref[layer]               # (4L, 4L) bf16, rows [L:2L) live
        h_packed = jnp.zeros((B, L4), f32)    # h lives in lanes [L:2L)
        c_packed = jnp.zeros((B, L4), f32)    # c lives in lanes [L:2L)
        hs = []
        for t in range(T):
            gates = gx_scr[t] + bdot(h_packed, whh_l)           # (B, 4L)
            # one EUP push: sigmoid on i/f/o lanes, tanh on g lanes
            act = jnp.tanh(gates * g_scale) * g_scale + g_add   # [si|sf|tg|so]
            r2 = pltpu.roll(act, 2 * L, axis=1)                 # [tg|so|si|sf]
            prod = act * r2                                     # [0:L) = si*tg
            # c' = f*c + i*g   (valid in lanes [L:2L); other lanes carry
            # bounded junk that padded weights / packed heads multiply by 0)
            c_packed = pltpu.roll(prod, L, axis=1) + act * c_packed
            # h' = o * tanh(c')  (valid in lanes [L:2L))
            h_packed = r2 * jnp.tanh(c_packed)
            if layer + 1 < n_layers:
                hs.append(h_packed)
        if layer + 1 < n_layers:
            # keep next layer's input packed (no VMEM round trip at these sizes)
            xs_packed = jnp.concatenate(hs, axis=0)             # (T*B, 4L)

    # ---- action head (MLPPosEmb): sinusoidal phase embedding + MLP ----------
    cond = cond_ref[...]
    C = cond.shape[1]
    phase = cond[:, C - 1:C]                                    # (B, 1)
    emb = phase * freqs_ref[...]                                # (B, half_dim)
    # single merged first dot over [h_packed | cond[:-1] | sin | cos]
    zcat = jnp.concatenate(
        [h_packed, cond[:, :C - 1], jnp.sin(emb), jnp.cos(emb)], axis=1)
    z = _prelu(bdot(zcat, wa1_ref[...]) + ba1_ref[...], aa1)
    z = _prelu(bdot(z, wa2_ref[...]) + ba2_ref[...], aa2)
    out_ref[...] = bdot(z, wa3_ref[...]) + ba3_ref[...]


def lstm_hist_forward(x, p, *, B, T, S, L, C, n_layers, out_dim):
    # glue: split + time-major reorder (pure reshape/transpose, no compute)
    hist_tm = x[:, :T * S].reshape(B, T, S).transpose(1, 0, 2).reshape(T * B, S)
    cond = x[:, T * S:]

    kernel = functools.partial(lstm_hist_kernel, B, T, S, L, n_layers)
    args = (hist_tm, cond, p['alphas'],
            p['w1'], p['b1'], p['w2'], p['b2'],
            p['w3g'], p['bg0'],
            p['wihp'], p['whhp'], p['blstm'],
            p['freqs'],
            p['wa1'], p['ba1'], p['wa2'], p['ba2'], p['wa3'], p['ba3'])

    smem_args = {2}   # packed PReLU alphas -> scalar memory
    in_specs = [
        pl.BlockSpec(memory_space=pltpu.MemorySpace.SMEM) if i in smem_args
        else pl.BlockSpec(memory_space=pltpu.MemorySpace.VMEM)
        for i in range(len(args))
    ]

    return pl.pallas_call(
        kernel,
        out_shape=jax.ShapeDtypeStruct((B, out_dim), jnp.float32),
        in_specs=in_specs,
        out_specs=pl.BlockSpec(memory_space=pltpu.MemorySpace.VMEM),
        scratch_shapes=[pltpu.VMEM((T, B, 4 * L), jnp.float32)],   # staged gates
    )(*args)


def init_raw_params(key, S, L, C, out_dim, n_layers, pose_dim):
    """PyTorch-layout f32 parameters (the 'spec' weights)."""
    half = pose_dim // 2
    keys = jax.random.split(key, 20)

    def nrm(k, shape, scale=0.1):
        return scale * jax.random.normal(k, shape, dtype=jnp.float32)

    L2 = 2 * L
    r = {}
    # [encoder PReLU1, encoder PReLU2, head PReLU1, head PReLU2] (default 0.25)
    r['alphas'] = jnp.full((4,), 0.25, jnp.float32)
    # state encoder: MLP(S, L, n_hidden=1, latent_dim=2L)
    r['w1'] = nrm(keys[0], (S, L2));   r['b1'] = nrm(keys[1], (1, L2))
    r['w2'] = nrm(keys[2], (L2, L2));  r['b2'] = nrm(keys[3], (1, L2))
    r['w3'] = nrm(keys[4], (L2, L));   r['b3'] = nrm(keys[5], (1, L))
    # LSTM(input=L, hidden=L, num_layers=n_layers), gate order i,f,g,o
    r['wih'] = nrm(keys[6], (n_layers, L, 4 * L))
    r['whh'] = nrm(keys[7], (n_layers, L, 4 * L))
    r['bih'] = nrm(keys[8], (n_layers, 1, 4 * L))
    r['bhh'] = nrm(keys[9], (n_layers, 1, 4 * L))
    # SinusoidalPosEmb frequencies: 1 / 0.0001 ** (2*(k//2)/half_dim)
    k = np.arange(half)
    r['freqs'] = jnp.asarray(1.0 / (0.0001 ** (2.0 * (k // 2) / half)),
                             jnp.float32).reshape(1, half)
    # action MLP: first Linear split as [h_last rows | (cond[:-1]|sin|cos) rows]
    feat_dim = C - 1 + pose_dim
    r['wa1h'] = nrm(keys[10], (L, L))
    r['wa1x'] = nrm(keys[11], (feat_dim, L))
    r['ba1'] = nrm(keys[12], (1, L))
    r['wa2'] = nrm(keys[13], (L, L));        r['ba2'] = nrm(keys[14], (1, L))
    r['wa3'] = nrm(keys[15], (L, out_dim));  r['ba3'] = nrm(keys[16], (1, out_dim))
    return r


def pack_params(r, *, L, n_layers, C, pose_dim):
    """Fold / zero-pad / bf16-cast the raw params for the packed-lane kernel."""
    bf16 = jnp.bfloat16
    L4 = 4 * L
    p = {}
    p['alphas'] = r['alphas']
    p['w1'] = r['w1'].astype(bf16); p['b1'] = r['b1']
    p['w2'] = r['w2'].astype(bf16); p['b2'] = r['b2']
    # fold encoder's last Linear into layer-0's LSTM input projection
    p['w3g'] = (r['w3'] @ r['wih'][0]).astype(bf16)                   # (2L, 4L)
    p['bg0'] = r['b3'] @ r['wih'][0] + r['bih'][0] + r['bhh'][0]      # (1, 4L)
    # zero-pad W_ih (layers >= 1) / W_hh so the packed (B,4L) h feeds the MXU
    # directly: h lives in lanes [L:2L), all other contraction rows are zero.
    wihp = jnp.zeros((n_layers, L4, L4), jnp.float32).at[:, L:2 * L, :].set(r['wih'])
    whhp = jnp.zeros((n_layers, L4, L4), jnp.float32).at[:, L:2 * L, :].set(r['whh'])
    p['wihp'] = wihp.astype(bf16)
    p['whhp'] = whhp.astype(bf16)
    p['blstm'] = r['bih'] + r['bhh']                                  # (nl,1,4L)
    p['freqs'] = r['freqs']
    # action-head first Linear packed for the merged [h_packed | feat] dot
    feat_dim = C - 1 + pose_dim
    wa1 = jnp.zeros((L4 + feat_dim, L), jnp.float32)
    wa1 = wa1.at[L:2 * L, :].set(r['wa1h'])
    wa1 = wa1.at[L4:, :].set(r['wa1x'])
    p['wa1'] = wa1.astype(bf16); p['ba1'] = r['ba1']
    p['wa2'] = r['wa2'].astype(bf16); p['ba2'] = r['ba2']
    p['wa3'] = r['wa3'].astype(bf16); p['ba3'] = r['ba3']
    return p


def reference_forward_match(x, p, *, B, T, S, L, C, n_layers):
    """Pure-JAX mirror of the kernel's arithmetic (folded/padded bf16 weights,
    fused sigmoid-via-tanh), using the L-wide (unpacked) state."""
    f32 = jnp.float32
    bf16 = jnp.bfloat16
    L4 = 4 * L

    def dot(a, w):
        return jnp.dot(a.astype(bf16), w, preferred_element_type=f32)

    a1, a2, aa1, aa2 = (p['alphas'][i] for i in range(4))
    hist = x[:, :T * S].reshape(B, T, S).transpose(1, 0, 2).reshape(T * B, S)
    h = _prelu(dot(hist, p['w1']) + p['b1'], a1)
    h = _prelu(dot(h, p['w2']) + p['b2'], a2)
    hs = None
    xs = None
    for layer in range(n_layers):
        if layer == 0:
            gates_x = dot(h, p['w3g']) + p['bg0']
        else:
            gates_x = dot(xs, p['wihp'][layer, L:2 * L, :]) + p['blstm'][layer]
        whh_b = p['whhp'][layer, L:2 * L, :]
        hs = jnp.zeros((B, L), f32)
        cs = jnp.zeros((B, L), f32)
        outs = []
        for t in range(T):
            g = gates_x[t * B:(t + 1) * B, :] + dot(hs, whh_b)
            si = 0.5 * jnp.tanh(0.5 * g[:, :L]) + 0.5
            sf = 0.5 * jnp.tanh(0.5 * g[:, L:2 * L]) + 0.5
            tg = jnp.tanh(g[:, 2 * L:3 * L])
            so = 0.5 * jnp.tanh(0.5 * g[:, 3 * L:]) + 0.5
            cs = sf * cs + si * tg
            hs = so * jnp.tanh(cs)
            outs.append(hs)
        xs = jnp.concatenate(outs, axis=0)
    cond = x[:, T * S:]
    phase = cond[:, -1:]
    emb = phase * p['freqs']
    feat = jnp.concatenate([cond[:, :-1], jnp.sin(emb), jnp.cos(emb)], axis=1)
    z = dot(hs, p['wa1'][L:2 * L, :]) + dot(feat, p['wa1'][L4:, :]) + p['ba1']
    z = _prelu(z, aa1)
    z = _prelu(dot(z, p['wa2']) + p['ba2'], aa2)
    return dot(z, p['wa3']) + p['ba3']


def reference_forward_f32(x, r, *, B, T, S, L, C, n_layers):
    """Pure-JAX f32 mirror of the original PyTorch forward (semantic check)."""
    f32 = jnp.float32
    a1, a2, aa1, aa2 = (r['alphas'][i] for i in range(4))
    hist = x[:, :T * S].reshape(B * T, S)
    h = _prelu(hist @ r['w1'] + r['b1'], a1)
    h = _prelu(h @ r['w2'] + r['b2'], a2)
    xs = (h @ r['w3'] + r['b3']).reshape(B, T, L)
    hs = None
    for layer in range(n_layers):
        hs = jnp.zeros((B, L), f32)
        cs = jnp.zeros((B, L), f32)
        outs = []
        for t in range(T):
            g = (xs[:, t, :] @ r['wih'][layer] + hs @ r['whh'][layer]
                 + r['bih'][layer] + r['bhh'][layer])
            i = jax.nn.sigmoid(g[:, :L])
            f = jax.nn.sigmoid(g[:, L:2 * L])
            gg = jnp.tanh(g[:, 2 * L:3 * L])
            o = jax.nn.sigmoid(g[:, 3 * L:])
            cs = f * cs + i * gg
            hs = o * jnp.tanh(cs)
            outs.append(hs)
        xs = jnp.stack(outs, axis=1)
    cond = x[:, T * S:]
    phase = cond[:, -1:]
    emb = phase * r['freqs']
    feat = jnp.concatenate([cond[:, :-1], jnp.sin(emb), jnp.cos(emb)], axis=1)
    z = _prelu(hs @ r['wa1h'] + feat @ r['wa1x'] + r['ba1'], aa1)
    z = _prelu(z @ r['wa2'] + r['ba2'], aa2)
    return z @ r['wa3'] + r['ba3']


if __name__ == "__main__":
    # module hyper-params (small, consistent with the PyTorch forward)
    B = 2                 # batch
    S = 4                 # state_dim
    T = 8                 # history_length
    L = 32                # latent_dim
    n_layers = 2          # LSTM layers
    out_dim = 8           # output_dim
    C = 5                 # cond_dim = input_dim - state_dim (input_dim = 9)
    pose_dim = L // 4     # 8 (SinusoidalPosEmb dim)

    key = jax.random.PRNGKey(0)
    kx, kp = jax.random.split(key)
    x = jax.random.normal(kx, (B, T * S + C), dtype=jnp.float32)   # (2, 37)
    raw = init_raw_params(kp, S, L, C, out_dim, n_layers, pose_dim)
    params = pack_params(raw, L=L, n_layers=n_layers, C=C, pose_dim=pose_dim)

    out = lstm_hist_forward(x, params, B=B, T=T, S=S, L=L, C=C,
                            n_layers=n_layers, out_dim=out_dim)
    out = jax.block_until_ready(out)

    # tight check vs. a pure-JAX mirror of the kernel's own arithmetic
    ref_match = reference_forward_match(x, params, B=B, T=T, S=S, L=L, C=C,
                                        n_layers=n_layers)
    np.testing.assert_allclose(np.asarray(out), np.asarray(ref_match),
                               rtol=2e-4, atol=2e-4)

    # loose check vs. the f32 PyTorch-faithful forward (bf16-weight tolerance)
    ref_f32 = reference_forward_f32(x, raw, B=B, T=T, S=S, L=L, C=C,
                                    n_layers=n_layers)
    np.testing.assert_allclose(np.asarray(out), np.asarray(ref_f32),
                               rtol=8e-2, atol=5e-2)

    print("KERNEL_OK")
</pallas_src>

<mosaic_0001>
module attributes {stable_mosaic.version = 11 : i64} {
  func.func @lstm_hist_kernel(%arg0: memref<16x4xf32, #tpu.memory_space<vmem>>, %arg1: memref<2x5xf32, #tpu.memory_space<vmem>>, %arg2: memref<4xf32, #tpu.memory_space<smem>>, %arg3: memref<4x64xbf16, #tpu.memory_space<vmem>>, %arg4: memref<1x64xf32, #tpu.memory_space<vmem>>, %arg5: memref<64x64xbf16, #tpu.memory_space<vmem>>, %arg6: memref<1x64xf32, #tpu.memory_space<vmem>>, %arg7: memref<64x128xbf16, #tpu.memory_space<vmem>>, %arg8: memref<1x128xf32, #tpu.memory_space<vmem>>, %arg9: memref<2x128x128xbf16, #tpu.memory_space<vmem>>, %arg10: memref<2x128x128xbf16, #tpu.memory_space<vmem>>, %arg11: memref<2x1x128xf32, #tpu.memory_space<vmem>>, %arg12: memref<1x4xf32, #tpu.memory_space<vmem>>, %arg13: memref<140x32xbf16, #tpu.memory_space<vmem>>, %arg14: memref<1x32xf32, #tpu.memory_space<vmem>>, %arg15: memref<32x32xbf16, #tpu.memory_space<vmem>>, %arg16: memref<1x32xf32, #tpu.memory_space<vmem>>, %arg17: memref<32x8xbf16, #tpu.memory_space<vmem>>, %arg18: memref<1x8xf32, #tpu.memory_space<vmem>>, %arg19: memref<2x8xf32, #tpu.memory_space<vmem>>, %arg20: memref<8x2x128xf32, #tpu.memory_space<vmem>>) attributes {dimension_semantics = [], scalar_prefetch = 0 : i64, scratch_operands = 1 : i64, tpu.core_type = #tpu.core_type<tc>} {
    %c0 = arith.constant 0 : index
    %0 = memref.load %arg2[%c0] : memref<4xf32, #tpu.memory_space<smem>>
    %c1 = arith.constant 1 : index
    %1 = memref.load %arg2[%c1] : memref<4xf32, #tpu.memory_space<smem>>
    %c2 = arith.constant 2 : index
    %2 = memref.load %arg2[%c2] : memref<4xf32, #tpu.memory_space<smem>>
    %c3 = arith.constant 3 : index
    %3 = memref.load %arg2[%c3] : memref<4xf32, #tpu.memory_space<smem>>
    %c0_0 = arith.constant 0 : index
    %c0_1 = arith.constant 0 : index
    %4 = vector.load %arg0[%c0_0, %c0_1] : memref<16x4xf32, #tpu.memory_space<vmem>>, vector<16x4xf32>
    %c0_2 = arith.constant 0 : index
    %c0_3 = arith.constant 0 : index
    %5 = vector.load %arg3[%c0_2, %c0_3] : memref<4x64xbf16, #tpu.memory_space<vmem>>, vector<4x64xbf16>
    %6 = arith.truncf %4 : vector<16x4xf32> to vector<16x4xbf16>
    %cst = arith.constant dense<0.000000e+00> : vector<16x64xf32>
    %7 = tpu.matmul %6, %5, %cst {dimension_numbers = #tpu.dot_dimension_numbers<[1], [0], [0], [1], [0, 0, 1, 1], [], []>} : vector<16x4xbf16>, vector<4x64xbf16>, vector<16x64xf32> -> vector<16x64xf32>
    %c0_4 = arith.constant 0 : index
    %c0_5 = arith.constant 0 : index
    %8 = vector.load %arg4[%c0_4, %c0_5] : memref<1x64xf32, #tpu.memory_space<vmem>>, vector<1x64xf32>
    %9 = vector.broadcast %8 : vector<1x64xf32> to vector<16x64xf32>
    %10 = arith.addf %7, %9 : vector<16x64xf32>
    %cst_6 = arith.constant 0.000000e+00 : f32
    %11 = vector.broadcast %cst_6 : f32 to vector<16x64xf32>
    %12 = arith.cmpf oge, %10, %11 : vector<16x64xf32>
    %13 = vector.broadcast %0 : f32 to vector<16x64xf32>
    %14 = arith.mulf %13, %10 : vector<16x64xf32>
    %15 = arith.select %12, %10, %14 : vector<16x64xi1>, vector<16x64xf32>
    %c0_7 = arith.constant 0 : index
    %c0_8 = arith.constant 0 : index
    %16 = vector.load %arg5[%c0_7, %c0_8] : memref<64x64xbf16, #tpu.memory_space<vmem>>, vector<64x64xbf16>
    %17 = arith.truncf %15 : vector<16x64xf32> to vector<16x64xbf16>
    %cst_9 = arith.constant dense<0.000000e+00> : vector<16x64xf32>
    %18 = tpu.matmul %17, %16, %cst_9 {dimension_numbers = #tpu.dot_dimension_numbers<[1], [0], [0], [1], [0, 0, 1, 1], [], []>} : vector<16x64xbf16>, vector<64x64xbf16>, vector<16x64xf32> -> vector<16x64xf32>
    %c0_10 = arith.constant 0 : index
    %c0_11 = arith.constant 0 : index
    %19 = vector.load %arg6[%c0_10, %c0_11] : memref<1x64xf32, #tpu.memory_space<vmem>>, vector<1x64xf32>
    %20 = vector.broadcast %19 : vector<1x64xf32> to vector<16x64xf32>
    %21 = arith.addf %18, %20 : vector<16x64xf32>
    %cst_12 = arith.constant 0.000000e+00 : f32
    %22 = vector.broadcast %cst_12 : f32 to vector<16x64xf32>
    %23 = arith.cmpf oge, %21, %22 : vector<16x64xf32>
    %24 = vector.broadcast %1 : f32 to vector<16x64xf32>
    %25 = arith.mulf %24, %21 : vector<16x64xf32>
    %26 = arith.select %23, %21, %25 : vector<16x64xi1>, vector<16x64xf32>
    %27 = tpu.iota {dimensions = array<i32: 1>} : vector<2x128xi32>
    %c64_i32 = arith.constant 64 : i32
    %28 = vector.broadcast %c64_i32 : i32 to vector<2x128xi32>
    %29 = arith.cmpi sge, %27, %28 : vector<2x128xi32>
    %c96_i32 = arith.constant 96 : i32
    %30 = vector.broadcast %c96_i32 : i32 to vector<2x128xi32>
    %31 = arith.cmpi slt, %27, %30 : vector<2x128xi32>
    %32 = arith.andi %29, %31 : vector<2x128xi1>
    %cst_13 = arith.constant 1.000000e+00 : f32
    %cst_14 = arith.constant 5.000000e-01 : f32
    %33 = vector.broadcast %cst_13 : f32 to vector<2x128xf32>
    %34 = vector.broadcast %cst_14 : f32 to vector<2x128xf32>
    %35 = arith.select %32, %33, %34 : vector<2x128xi1>, vector<2x128xf32>
    %cst_15 = arith.constant 0.000000e+00 : f32
    %cst_16 = arith.constant 5.000000e-01 : f32
    %36 = vector.broadcast %cst_15 : f32 to vector<2x128xf32>
    %37 = vector.broadcast %cst_16 : f32 to vector<2x128xf32>
    %38 = arith.select %32, %36, %37 : vector<2x128xi1>, vector<2x128xf32>
    %c0_17 = arith.constant 0 : index
    %c0_18 = arith.constant 0 : index
    %39 = vector.load %arg7[%c0_17, %c0_18] : memref<64x128xbf16, #tpu.memory_space<vmem>>, vector<64x128xbf16>
    %40 = arith.truncf %26 : vector<16x64xf32> to vector<16x64xbf16>
    %cst_19 = arith.constant dense<0.000000e+00> : vector<16x128xf32>
    %41 = tpu.matmul %40, %39, %cst_19 {dimension_numbers = #tpu.dot_dimension_numbers<[1], [0], [0], [1], [0, 0, 1, 1], [], []>} : vector<16x64xbf16>, vector<64x128xbf16>, vector<16x128xf32> -> vector<16x128xf32>
    %c0_20 = arith.constant 0 : index
    %c0_21 = arith.constant 0 : index
    %42 = vector.load %arg8[%c0_20, %c0_21] : memref<1x128xf32, #tpu.memory_space<vmem>>, vector<1x128xf32>
    %43 = vector.broadcast %42 : vector<1x128xf32> to vector<16x128xf32>
    %44 = arith.addf %41, %43 : vector<16x128xf32>
    %45 = vector.extract_strided_slice %44 {offsets = [0, 0], sizes = [2, 128], strides = [1, 1]} : vector<16x128xf32> to vector<2x128xf32>
    %c0_22 = arith.constant 0 : index
    %c0_23 = arith.constant 0 : index
    %c0_24 = arith.constant 0 : index
    %46 = vector.load %arg20[%c0_22, %c0_23, %c0_24] : memref<8x2x128xf32, #tpu.memory_space<vmem>>, vector<1x2x128xf32>
    %47 = vector.shape_cast %46 : vector<1x2x128xf32> to vector<2x128xf32>
    %48 = vector.shape_cast %45 : vector<2x128xf32> to vector<1x2x128xf32>
    tpu.vector_store %arg20[%c0_22, %c0_23, %c0_24], %48 {strides = array<i32>} : memref<8x2x128xf32, #tpu.memory_space<vmem>>, vector<1x2x128xf32>,
    %49 = vector.extract_strided_slice %44 {offsets = [2, 0], sizes = [2, 128], strides = [1, 1]} : vector<16x128xf32> to vector<2x128xf32>
    %c1_25 = arith.constant 1 : index
    %c0_26 = arith.constant 0 : index
    %c0_27 = arith.constant 0 : index
    %50 = vector.load %arg20[%c1_25, %c0_26, %c0_27] : memref<8x2x128xf32, #tpu.memory_space<vmem>>, vector<1x2x128xf32>
    %51 = vector.shape_cast %50 : vector<1x2x128xf32> to vector<2x128xf32>
    %52 = vector.shape_cast %49 : vector<2x128xf32> to vector<1x2x128xf32>
    tpu.vector_store %arg20[%c1_25, %c0_26, %c0_27], %52 {strides = array<i32>} : memref<8x2x128xf32, #tpu.memory_space<vmem>>, vector<1x2x128xf32>,
    %53 = vector.extract_strided_slice %44 {offsets = [4, 0], sizes = [2, 128], strides = [1, 1]} : vector<16x128xf32> to vector<2x128xf32>
    %c2_28 = arith.constant 2 : index
    %c0_29 = arith.constant 0 : index
    %c0_30 = arith.constant 0 : index
    %54 = vector.load %arg20[%c2_28, %c0_29, %c0_30] : memref<8x2x128xf32, #tpu.memory_space<vmem>>, vector<1x2x128xf32>
    %55 = vector.shape_cast %54 : vector<1x2x128xf32> to vector<2x128xf32>
    %56 = vector.shape_cast %53 : vector<2x128xf32> to vector<1x2x128xf32>
    tpu.vector_store %arg20[%c2_28, %c0_29, %c0_30], %56 {strides = array<i32>} : memref<8x2x128xf32, #tpu.memory_space<vmem>>, vector<1x2x128xf32>,
    %57 = vector.extract_strided_slice %44 {offsets = [6, 0], sizes = [2, 128], strides = [1, 1]} : vector<16x128xf32> to vector<2x128xf32>
    %c3_31 = arith.constant 3 : index
    %c0_32 = arith.constant 0 : index
    %c0_33 = arith.constant 0 : index
    %58 = vector.load %arg20[%c3_31, %c0_32, %c0_33] : memref<8x2x128xf32, #tpu.memory_space<vmem>>, vector<1x2x128xf32>
    %59 = vector.shape_cast %58 : vector<1x2x128xf32> to vector<2x128xf32>
    %60 = vector.shape_cast %57 : vector<2x128xf32> to vector<1x2x128xf32>
    tpu.vector_store %arg20[%c3_31, %c0_32, %c0_33], %60 {strides = array<i32>} : memref<8x2x128xf32, #tpu.memory_space<vmem>>, vector<1x2x128xf32>,
    %61 = vector.extract_strided_slice %44 {offsets = [8, 0], sizes = [2, 128], strides = [1, 1]} : vector<16x128xf32> to vector<2x128xf32>
    %c4 = arith.constant 4 : index
    %c0_34 = arith.constant 0 : index
    %c0_35 = arith.constant 0 : index
    %62 = vector.load %arg20[%c4, %c0_34, %c0_35] : memref<8x2x128xf32, #tpu.memory_space<vmem>>, vector<1x2x128xf32>
    %63 = vector.shape_cast %62 : vector<1x2x128xf32> to vector<2x128xf32>
    %64 = vector.shape_cast %61 : vector<2x128xf32> to vector<1x2x128xf32>
    tpu.vector_store %arg20[%c4, %c0_34, %c0_35], %64 {strides = array<i32>} : memref<8x2x128xf32, #tpu.memory_space<vmem>>, vector<1x2x128xf32>,
    %65 = vector.extract_strided_slice %44 {offsets = [10, 0], sizes = [2, 128], strides = [1, 1]} : vector<16x128xf32> to vector<2x128xf32>
    %c5 = arith.constant 5 : index
    %c0_36 = arith.constant 0 : index
    %c0_37 = arith.constant 0 : index
    %66 = vector.load %arg20[%c5, %c0_36, %c0_37] : memref<8x2x128xf32, #tpu.memory_space<vmem>>, vector<1x2x128xf32>
    %67 = vector.shape_cast %66 : vector<1x2x128xf32> to vector<2x128xf32>
    %68 = vector.shape_cast %65 : vector<2x128xf32> to vector<1x2x128xf32>
    tpu.vector_store %arg20[%c5, %c0_36, %c0_37], %68 {strides = array<i32>} : memref<8x2x128xf32, #tpu.memory_space<vmem>>, vector<1x2x128xf32>,
    %69 = vector.extract_strided_slice %44 {offsets = [12, 0], sizes = [2, 128], strides = [1, 1]} : vector<16x128xf32> to vector<2x128xf32>
    %c6 = arith.constant 6 : index
    %c0_38 = arith.constant 0 : index
    %c0_39 = arith.constant 0 : index
    %70 = vector.load %arg20[%c6, %c0_38, %c0_39] : memref<8x2x128xf32, #tpu.memory_space<vmem>>, vector<1x2x128xf32>
    %71 = vector.shape_cast %70 : vector<1x2x128xf32> to vector<2x128xf32>
    %72 = vector.shape_cast %69 : vector<2x128xf32> to vector<1x2x128xf32>
    tpu.vector_store %arg20[%c6, %c0_38, %c0_39], %72 {strides = array<i32>} : memref<8x2x128xf32, #tpu.memory_space<vmem>>, vector<1x2x128xf32>,
    %73 = vector.extract_strided_slice %44 {offsets = [14, 0], sizes = [2, 128], strides = [1, 1]} : vector<16x128xf32> to vector<2x128xf32>
    %c7 = arith.constant 7 : index
    %c0_40 = arith.constant 0 : index
    %c0_41 = arith.constant 0 : index
    %74 = vector.load %arg20[%c7, %c0_40, %c0_41] : memref<8x2x128xf32, #tpu.memory_space<vmem>>, vector<1x2x128xf32>
    %75 = vector.shape_cast %74 : vector<1x2x128xf32> to vector<2x128xf32>
    %76 = vector.shape_cast %73 : vector<2x128xf32> to vector<1x2x128xf32>
    tpu.vector_store %arg20[%c7, %c0_40, %c0_41], %76 {strides = array<i32>} : memref<8x2x128xf32, #tpu.memory_space<vmem>>, vector<1x2x128xf32>,
    %c0_42 = arith.constant 0 : index
    %c0_43 = arith.constant 0 : index
    %c0_44 = arith.constant 0 : index
    %77 = vector.load %arg10[%c0_42, %c0_43, %c0_44] : memref<2x128x128xbf16, #tpu.memory_space<vmem>>, vector<1x128x128xbf16>
    %78 = vector.shape_cast %77 : vector<1x128x128xbf16> to vector<128x128xbf16>
    %cst_45 = arith.constant 0.000000e+00 : f32
    %79 = vector.broadcast %cst_45 : f32 to vector<2x128xf32>
    %cst_46 = arith.constant 0.000000e+00 : f32
    %80 = vector.broadcast %cst_46 : f32 to vector<2x128xf32>
    %c0_47 = arith.constant 0 : index
    %c0_48 = arith.constant 0 : index
    %c0_49 = arith.constant 0 : index
    %81 = vector.load %arg20[%c0_47, %c0_48, %c0_49] : memref<8x2x128xf32, #tpu.memory_space<vmem>>, vector<1x2x128xf32>
    %82 = vector.shape_cast %81 : vector<1x2x128xf32> to vector<2x128xf32>
    %83 = arith.truncf %79 : vector<2x128xf32> to vector<2x128xbf16>
    %cst_50 = arith.constant dense<0.000000e+00> : vector<2x128xf32>
    %84 = tpu.matmul %83, %78, %cst_50 {dimension_numbers = #tpu.dot_dimension_numbers<[1], [0], [0], [1], [0, 0, 1, 1], [], []>} : vector<2x128xbf16>, vector<128x128xbf16>, vector<2x128xf32> -> vector<2x128xf32>
    %85 = arith.addf %82, %84 : vector<2x128xf32>
    %86 = arith.mulf %85, %35 : vector<2x128xf32>
    %87 = math.tanh %86 : vector<2x128xf32>
    %88 = arith.mulf %87, %35 : vector<2x128xf32>
    %89 = arith.addf %88, %38 : vector<2x128xf32>
    %c64_i32_51 = arith.constant 64 : i32
    %90 = tpu.dynamic_rotate %89 by %c64_i32_51 dim 1 : vector<2x128xf32>, i32 -> vector<2x128xf32>
    %91 = arith.mulf %89, %90 : vector<2x128xf32>
    %c32_i32 = arith.constant 32 : i32
    %92 = tpu.dynamic_rotate %91 by %c32_i32 dim 1 : vector<2x128xf32>, i32 -> vector<2x128xf32>
    %93 = arith.mulf %89, %80 : vector<2x128xf32>
    %94 = arith.addf %92, %93 : vector<2x128xf32>
    %95 = math.tanh %94 : vector<2x128xf32>
    %96 = arith.mulf %90, %95 : vector<2x128xf32>
    %c1_52 = arith.constant 1 : index
    %c0_53 = arith.constant 0 : index
    %c0_54 = arith.constant 0 : index
    %97 = vector.load %arg20[%c1_52, %c0_53, %c0_54] : memref<8x2x128xf32, #tpu.memory_space<vmem>>, vector<1x2x128xf32>
    %98 = vector.shape_cast %97 : vector<1x2x128xf32> to vector<2x128xf32>
    %99 = arith.truncf %96 : vector<2x128xf32> to vector<2x128xbf16>
    %cst_55 = arith.constant dense<0.000000e+00> : vector<2x128xf32>
    %100 = tpu.matmul %99, %78, %cst_55 {dimension_numbers = #tpu.dot_dimension_numbers<[1], [0], [0], [1], [0, 0, 1, 1], [], []>} : vector<2x128xbf16>, vector<128x128xbf16>, vector<2x128xf32> -> vector<2x128xf32>
    %101 = arith.addf %98, %100 : vector<2x128xf32>
    %102 = arith.mulf %101, %35 : vector<2x128xf32>
    %103 = math.tanh %102 : vector<2x128xf32>
    %104 = arith.mulf %103, %35 : vector<2x128xf32>
    %105 = arith.addf %104, %38 : vector<2x128xf32>
    %c64_i32_56 = arith.constant 64 : i32
    %106 = tpu.dynamic_rotate %105 by %c64_i32_56 dim 1 : vector<2x128xf32>, i32 -> vector<2x128xf32>
    %107 = arith.mulf %105, %106 : vector<2x128xf32>
    %c32_i32_57 = arith.constant 32 : i32
    %108 = tpu.dynamic_rotate %107 by %c32_i32_57 dim 1 : vector<2x128xf32>, i32 -> vector<2x128xf32>
    %109 = arith.mulf %105, %94 : vector<2x128xf32>
    %110 = arith.addf %108, %109 : vector<2x128xf32>
    %111 = math.tanh %110 : vector<2x128xf32>
    %112 = arith.mulf %106, %111 : vector<2x128xf32>
    %c2_58 = arith.constant 2 : index
    %c0_59 = arith.constant 0 : index
    %c0_60 = arith.constant 0 : index
    %113 = vector.load %arg20[%c2_58, %c0_59, %c0_60] : memref<8x2x128xf32, #tpu.memory_space<vmem>>, vector<1x2x128xf32>
    %114 = vector.shape_cast %113 : vector<1x2x128xf32> to vector<2x128xf32>
    %115 = arith.truncf %112 : vector<2x128xf32> to vector<2x128xbf16>
    %cst_61 = arith.constant dense<0.000000e+00> : vector<2x128xf32>
    %116 = tpu.matmul %115, %78, %cst_61 {dimension_numbers = #tpu.dot_dimension_numbers<[1], [0], [0], [1], [0, 0, 1, 1], [], []>} : vector<2x128xbf16>, vector<128x128xbf16>, vector<2x128xf32> -> vector<2x128xf32>
    %117 = arith.addf %114, %116 : vector<2x128xf32>
    %118 = arith.mulf %117, %35 : vector<2x128xf32>
    %119 = math.tanh %118 : vector<2x128xf32>
    %120 = arith.mulf %119, %35 : vector<2x128xf32>
    %121 = arith.addf %120, %38 : vector<2x128xf32>
    %c64_i32_62 = arith.constant 64 : i32
    %122 = tpu.dynamic_rotate %121 by %c64_i32_62 dim 1 : vector<2x128xf32>, i32 -> vector<2x128xf32>
    %123 = arith.mulf %121, %122 : vector<2x128xf32>
    %c32_i32_63 = arith.constant 32 : i32
    %124 = tpu.dynamic_rotate %123 by %c32_i32_63 dim 1 : vector<2x128xf32>, i32 -> vector<2x128xf32>
    %125 = arith.mulf %121, %110 : vector<2x128xf32>
    %126 = arith.addf %124, %125 : vector<2x128xf32>
    %127 = math.tanh %126 : vector<2x128xf32>
    %128 = arith.mulf %122, %127 : vector<2x128xf32>
    %c3_64 = arith.constant 3 : index
    %c0_65 = arith.constant 0 : index
    %c0_66 = arith.constant 0 : index
    %129 = vector.load %arg20[%c3_64, %c0_65, %c0_66] : memref<8x2x128xf32, #tpu.memory_space<vmem>>, vector<1x2x128xf32>
    %130 = vector.shape_cast %129 : vector<1x2x128xf32> to vector<2x128xf32>
    %131 = arith.truncf %128 : vector<2x128xf32> to vector<2x128xbf16>
    %cst_67 = arith.constant dense<0.000000e+00> : vector<2x128xf32>
    %132 = tpu.matmul %131, %78, %cst_67 {dimension_numbers = #tpu.dot_dimension_numbers<[1], [0], [0], [1], [0, 0, 1, 1], [], []>} : vector<2x128xbf16>, vector<128x128xbf16>, vector<2x128xf32> -> vector<2x128xf32>
    %133 = arith.addf %130, %132 : vector<2x128xf32>
    %134 = arith.mulf %133, %35 : vector<2x128xf32>
    %135 = math.tanh %134 : vector<2x128xf32>
    %136 = arith.mulf %135, %35 : vector<2x128xf32>
    %137 = arith.addf %136, %38 : vector<2x128xf32>
    %c64_i32_68 = arith.constant 64 : i32
    %138 = tpu.dynamic_rotate %137 by %c64_i32_68 dim 1 : vector<2x128xf32>, i32 -> vector<2x128xf32>
    %139 = arith.mulf %137, %138 : vector<2x128xf32>
    %c32_i32_69 = arith.constant 32 : i32
    %140 = tpu.dynamic_rotate %139 by %c32_i32_69 dim 1 : vector<2x128xf32>, i32 -> vector<2x128xf32>
    %141 = arith.mulf %137, %126 : vector<2x128xf32>
    %142 = arith.addf %140, %141 : vector<2x128xf32>
    %143 = math.tanh %142 : vector<2x128xf32>
    %144 = arith.mulf %138, %143 : vector<2x128xf32>
    %c4_70 = arith.constant 4 : index
    %c0_71 = arith.constant 0 : index
    %c0_72 = arith.constant 0 : index
    %145 = vector.load %arg20[%c4_70, %c0_71, %c0_72] : memref<8x2x128xf32, #tpu.memory_space<vmem>>, vector<1x2x128xf32>
    %146 = vector.shape_cast %145 : vector<1x2x128xf32> to vector<2x128xf32>
    %147 = arith.truncf %144 : vector<2x128xf32> to vector<2x128xbf16>
    %cst_73 = arith.constant dense<0.000000e+00> : vector<2x128xf32>
    %148 = tpu.matmul %147, %78, %cst_73 {dimension_numbers = #tpu.dot_dimension_numbers<[1], [0], [0], [1], [0, 0, 1, 1], [], []>} : vector<2x128xbf16>, vector<128x128xbf16>, vector<2x128xf32> -> vector<2x128xf32>
    %149 = arith.addf %146, %148 : vector<2x128xf32>
    %150 = arith.mulf %149, %35 : vector<2x128xf32>
    %151 = math.tanh %150 : vector<2x128xf32>
    %152 = arith.mulf %151, %35 : vector<2x128xf32>
    %153 = arith.addf %152, %38 : vector<2x128xf32>
    %c64_i32_74 = arith.constant 64 : i32
    %154 = tpu.dynamic_rotate %153 by %c64_i32_74 dim 1 : vector<2x128xf32>, i32 -> vector<2x128xf32>
    %155 = arith.mulf %153, %154 : vector<2x128xf32>
    %c32_i32_75 = arith.constant 32 : i32
    %156 = tpu.dynamic_rotate %155 by %c32_i32_75 dim 1 : vector<2x128xf32>, i32 -> vector<2x128xf32>
    %157 = arith.mulf %153, %142 : vector<2x128xf32>
    %158 = arith.addf %156, %157 : vector<2x128xf32>
    %159 = math.tanh %158 : vector<2x128xf32>
    %160 = arith.mulf %154, %159 : vector<2x128xf32>
    %c5_76 = arith.constant 5 : index
    %c0_77 = arith.constant 0 : index
    %c0_78 = arith.constant 0 : index
    %161 = vector.load %arg20[%c5_76, %c0_77, %c0_78] : memref<8x2x128xf32, #tpu.memory_space<vmem>>, vector<1x2x128xf32>
    %162 = vector.shape_cast %161 : vector<1x2x128xf32> to vector<2x128xf32>
    %163 = arith.truncf %160 : vector<2x128xf32> to vector<2x128xbf16>
    %cst_79 = arith.constant dense<0.000000e+00> : vector<2x128xf32>
    %164 = tpu.matmul %163, %78, %cst_79 {dimension_numbers = #tpu.dot_dimension_numbers<[1], [0], [0], [1], [0, 0, 1, 1], [], []>} : vector<2x128xbf16>, vector<128x128xbf16>, vector<2x128xf32> -> vector<2x128xf32>
    %165 = arith.addf %162, %164 : vector<2x128xf32>
    %166 = arith.mulf %165, %35 : vector<2x128xf32>
    %167 = math.tanh %166 : vector<2x128xf32>
    %168 = arith.mulf %167, %35 : vector<2x128xf32>
    %169 = arith.addf %168, %38 : vector<2x128xf32>
    %c64_i32_80 = arith.constant 64 : i32
    %170 = tpu.dynamic_rotate %169 by %c64_i32_80 dim 1 : vector<2x128xf32>, i32 -> vector<2x128xf32>
    %171 = arith.mulf %169, %170 : vector<2x128xf32>
    %c32_i32_81 = arith.constant 32 : i32
    %172 = tpu.dynamic_rotate %171 by %c32_i32_81 dim 1 : vector<2x128xf32>, i32 -> vector<2x128xf32>
    %173 = arith.mulf %169, %158 : vector<2x128xf32>
    %174 = arith.addf %172, %173 : vector<2x128xf32>
    %175 = math.tanh %174 : vector<2x128xf32>
    %176 = arith.mulf %170, %175 : vector<2x128xf32>
    %c6_82 = arith.constant 6 : index
    %c0_83 = arith.constant 0 : index
    %c0_84 = arith.constant 0 : index
    %177 = vector.load %arg20[%c6_82, %c0_83, %c0_84] : memref<8x2x128xf32, #tpu.memory_space<vmem>>, vector<1x2x128xf32>
    %178 = vector.shape_cast %177 : vector<1x2x128xf32> to vector<2x128xf32>
    %179 = arith.truncf %176 : vector<2x128xf32> to vector<2x128xbf16>
    %cst_85 = arith.constant dense<0.000000e+00> : vector<2x128xf32>
    %180 = tpu.matmul %179, %78, %cst_85 {dimension_numbers = #tpu.dot_dimension_numbers<[1], [0], [0], [1], [0, 0, 1, 1], [], []>} : vector<2x128xbf16>, vector<128x128xbf16>, vector<2x128xf32> -> vector<2x128xf32>
    %181 = arith.addf %178, %180 : vector<2x128xf32>
    %182 = arith.mulf %181, %35 : vector<2x128xf32>
    %183 = math.tanh %182 : vector<2x128xf32>
    %184 = arith.mulf %183, %35 : vector<2x128xf32>
    %185 = arith.addf %184, %38 : vector<2x128xf32>
    %c64_i32_86 = arith.constant 64 : i32
    %186 = tpu.dynamic_rotate %185 by %c64_i32_86 dim 1 : vector<2x128xf32>, i32 -> vector<2x128xf32>
    %187 = arith.mulf %185, %186 : vector<2x128xf32>
    %c32_i32_87 = arith.constant 32 : i32
    %188 = tpu.dynamic_rotate %187 by %c32_i32_87 dim 1 : vector<2x128xf32>, i32 -> vector<2x128xf32>
    %189 = arith.mulf %185, %174 : vector<2x128xf32>
    %190 = arith.addf %188, %189 : vector<2x128xf32>
    %191 = math.tanh %190 : vector<2x128xf32>
    %192 = arith.mulf %186, %191 : vector<2x128xf32>
    %c7_88 = arith.constant 7 : index
    %c0_89 = arith.constant 0 : index
    %c0_90 = arith.constant 0 : index
    %193 = vector.load %arg20[%c7_88, %c0_89, %c0_90] : memref<8x2x128xf32, #tpu.memory_space<vmem>>, vector<1x2x128xf32>
    %194 = vector.shape_cast %193 : vector<1x2x128xf32> to vector<2x128xf32>
    %195 = arith.truncf %192 : vector<2x128xf32> to vector<2x128xbf16>
    %cst_91 = arith.constant dense<0.000000e+00> : vector<2x128xf32>
    %196 = tpu.matmul %195, %78, %cst_91 {dimension_numbers = #tpu.dot_dimension_numbers<[1], [0], [0], [1], [0, 0, 1, 1], [], []>} : vector<2x128xbf16>, vector<128x128xbf16>, vector<2x128xf32> -> vector<2x128xf32>
    %197 = arith.addf %194, %196 : vector<2x128xf32>
    %198 = arith.mulf %197, %35 : vector<2x128xf32>
    %199 = math.tanh %198 : vector<2x128xf32>
    %200 = arith.mulf %199, %35 : vector<2x128xf32>
    %201 = arith.addf %200, %38 : vector<2x128xf32>
    %c64_i32_92 = arith.constant 64 : i32
    %202 = tpu.dynamic_rotate %201 by %c64_i32_92 dim 1 : vector<2x128xf32>, i32 -> vector<2x128xf32>
    %203 = arith.mulf %201, %202 : vector<2x128xf32>
    %c32_i32_93 = arith.constant 32 : i32
    %204 = tpu.dynamic_rotate %203 by %c32_i32_93 dim 1 : vector<2x128xf32>, i32 -> vector<2x128xf32>
    %205 = arith.mulf %201, %190 : vector<2x128xf32>
    %206 = arith.addf %204, %205 : vector<2x128xf32>
    %207 = math.tanh %206 : vector<2x128xf32>
    %208 = arith.mulf %202, %207 : vector<2x128xf32>
    %209 = tpu.concatenate %96, %112, %128, %144, %160, %176, %192, %208 in 0 : vector<2x128xf32>, vector<2x128xf32>, vector<2x128xf32>, vector<2x128xf32>, vector<2x128xf32>, vector<2x128xf32>, vector<2x128xf32>, vector<2x128xf32> -> vector<16x128xf32>
    %c1_94 = arith.constant 1 : index
    %c0_95 = arith.constant 0 : index
    %c0_96 = arith.constant 0 : index
    %210 = vector.load %arg9[%c1_94, %c0_95, %c0_96] : memref<2x128x128xbf16, #tpu.memory_space<vmem>>, vector<1x128x128xbf16>
    %211 = vector.shape_cast %210 : vector<1x128x128xbf16> to vector<128x128xbf16>
    %212 = arith.truncf %209 : vector<16x128xf32> to vector<16x128xbf16>
    %cst_97 = arith.constant dense<0.000000e+00> : vector<16x128xf32>
    %213 = tpu.matmul %212, %211, %cst_97 {dimension_numbers = #tpu.dot_dimension_numbers<[1], [0], [0], [1], [0, 0, 1, 1], [], []>} : vector<16x128xbf16>, vector<128x128xbf16>, vector<16x128xf32> -> vector<16x128xf32>
    %c1_98 = arith.constant 1 : index
    %c0_99 = arith.constant 0 : index
    %c0_100 = arith.constant 0 : index
    %214 = vector.load %arg11[%c1_98, %c0_99, %c0_100] : memref<2x1x128xf32, #tpu.memory_space<vmem>>, vector<1x1x128xf32>
    %215 = vector.shape_cast %214 : vector<1x1x128xf32> to vector<1x128xf32>
    %216 = vector.broadcast %215 : vector<1x128xf32> to vector<16x128xf32>
    %217 = arith.addf %213, %216 : vector<16x128xf32>
    %218 = vector.extract_strided_slice %217 {offsets = [0, 0], sizes = [2, 128], strides = [1, 1]} : vector<16x128xf32> to vector<2x128xf32>
    %c0_101 = arith.constant 0 : index
    %c0_102 = arith.constant 0 : index
    %c0_103 = arith.constant 0 : index
    %219 = vector.load %arg20[%c0_101, %c0_102, %c0_103] : memref<8x2x128xf32, #tpu.memory_space<vmem>>, vector<1x2x128xf32>
    %220 = vector.shape_cast %219 : vector<1x2x128xf32> to vector<2x128xf32>
    %221 = vector.shape_cast %218 : vector<2x128xf32> to vector<1x2x128xf32>
    tpu.vector_store %arg20[%c0_101, %c0_102, %c0_103], %221 {strides = array<i32>} : memref<8x2x128xf32, #tpu.memory_space<vmem>>, vector<1x2x128xf32>,
    %222 = vector.extract_strided_slice %217 {offsets = [2, 0], sizes = [2, 128], strides = [1, 1]} : vector<16x128xf32> to vector<2x128xf32>
    %c1_104 = arith.constant 1 : index
    %c0_105 = arith.constant 0 : index
    %c0_106 = arith.constant 0 : index
    %223 = vector.load %arg20[%c1_104, %c0_105, %c0_106] : memref<8x2x128xf32, #tpu.memory_space<vmem>>, vector<1x2x128xf32>
    %224 = vector.shape_cast %223 : vector<1x2x128xf32> to vector<2x128xf32>
    %225 = vector.shape_cast %222 : vector<2x128xf32> to vector<1x2x128xf32>
    tpu.vector_store %arg20[%c1_104, %c0_105, %c0_106], %225 {strides = array<i32>} : memref<8x2x128xf32, #tpu.memory_space<vmem>>, vector<1x2x128xf32>,
    %226 = vector.extract_strided_slice %217 {offsets = [4, 0], sizes = [2, 128], strides = [1, 1]} : vector<16x128xf32> to vector<2x128xf32>
    %c2_107 = arith.constant 2 : index
    %c0_108 = arith.constant 0 : index
    %c0_109 = arith.constant 0 : index
    %227 = vector.load %arg20[%c2_107, %c0_108, %c0_109] : memref<8x2x128xf32, #tpu.memory_space<vmem>>, vector<1x2x128xf32>
    %228 = vector.shape_cast %227 : vector<1x2x128xf32> to vector<2x128xf32>
    %229 = vector.shape_cast %226 : vector<2x128xf32> to vector<1x2x128xf32>
    tpu.vector_store %arg20[%c2_107, %c0_108, %c0_109], %229 {strides = array<i32>} : memref<8x2x128xf32, #tpu.memory_space<vmem>>, vector<1x2x128xf32>,
    %230 = vector.extract_strided_slice %217 {offsets = [6, 0], sizes = [2, 128], strides = [1, 1]} : vector<16x128xf32> to vector<2x128xf32>
    %c3_110 = arith.constant 3 : index
    %c0_111 = arith.constant 0 : index
    %c0_112 = arith.constant 0 : index
    %231 = vector.load %arg20[%c3_110, %c0_111, %c0_112] : memref<8x2x128xf32, #tpu.memory_space<vmem>>, vector<1x2x128xf32>
    %232 = vector.shape_cast %231 : vector<1x2x128xf32> to vector<2x128xf32>
    %233 = vector.shape_cast %230 : vector<2x128xf32> to vector<1x2x128xf32>
    tpu.vector_store %arg20[%c3_110, %c0_111, %c0_112], %233 {strides = array<i32>} : memref<8x2x128xf32, #tpu.memory_space<vmem>>, vector<1x2x128xf32>,
    %234 = vector.extract_strided_slice %217 {offsets = [8, 0], sizes = [2, 128], strides = [1, 1]} : vector<16x128xf32> to vector<2x128xf32>
    %c4_113 = arith.constant 4 : index
    %c0_114 = arith.constant 0 : index
    %c0_115 = arith.constant 0 : index
    %235 = vector.load %arg20[%c4_113, %c0_114, %c0_115] : memref<8x2x128xf32, #tpu.memory_space<vmem>>, vector<1x2x128xf32>
    %236 = vector.shape_cast %235 : vector<1x2x128xf32> to vector<2x128xf32>
    %237 = vector.shape_cast %234 : vector<2x128xf32> to vector<1x2x128xf32>
    tpu.vector_store %arg20[%c4_113, %c0_114, %c0_115], %237 {strides = array<i32>} : memref<8x2x128xf32, #tpu.memory_space<vmem>>, vector<1x2x128xf32>,
    %238 = vector.extract_strided_slice %217 {offsets = [10, 0], sizes = [2, 128], strides = [1, 1]} : vector<16x128xf32> to vector<2x128xf32>
    %c5_116 = arith.constant 5 : index
    %c0_117 = arith.constant 0 : index
    %c0_118 = arith.constant 0 : index
    %239 = vector.load %arg20[%c5_116, %c0_117, %c0_118] : memref<8x2x128xf32, #tpu.memory_space<vmem>>, vector<1x2x128xf32>
    %240 = vector.shape_cast %239 : vector<1x2x128xf32> to vector<2x128xf32>
    %241 = vector.shape_cast %238 : vector<2x128xf32> to vector<1x2x128xf32>
    tpu.vector_store %arg20[%c5_116, %c0_117, %c0_118], %241 {strides = array<i32>} : memref<8x2x128xf32, #tpu.memory_space<vmem>>, vector<1x2x128xf32>,
    %242 = vector.extract_strided_slice %217 {offsets = [12, 0], sizes = [2, 128], strides = [1, 1]} : vector<16x128xf32> to vector<2x128xf32>
    %c6_119 = arith.constant 6 : index
    %c0_120 = arith.constant 0 : index
    %c0_121 = arith.constant 0 : index
    %243 = vector.load %arg20[%c6_119, %c0_120, %c0_121] : memref<8x2x128xf32, #tpu.memory_space<vmem>>, vector<1x2x128xf32>
    %244 = vector.shape_cast %243 : vector<1x2x128xf32> to vector<2x128xf32>
    %245 = vector.shape_cast %242 : vector<2x128xf32> to vector<1x2x128xf32>
    tpu.vector_store %arg20[%c6_119, %c0_120, %c0_121], %245 {strides = array<i32>} : memref<8x2x128xf32, #tpu.memory_space<vmem>>, vector<1x2x128xf32>,
    %246 = vector.extract_strided_slice %217 {offsets = [14, 0], sizes = [2, 128], strides = [1, 1]} : vector<16x128xf32> to vector<2x128xf32>
    %c7_122 = arith.constant 7 : index
    %c0_123 = arith.constant 0 : index
    %c0_124 = arith.constant 0 : index
    %247 = vector.load %arg20[%c7_122, %c0_123, %c0_124] : memref<8x2x128xf32, #tpu.memory_space<vmem>>, vector<1x2x128xf32>
    %248 = vector.shape_cast %247 : vector<1x2x128xf32> to vector<2x128xf32>
    %249 = vector.shape_cast %246 : vector<2x128xf32> to vector<1x2x128xf32>
    tpu.vector_store %arg20[%c7_122, %c0_123, %c0_124], %249 {strides = array<i32>} : memref<8x2x128xf32, #tpu.memory_space<vmem>>, vector<1x2x128xf32>,
    %c1_125 = arith.constant 1 : index
    %c0_126 = arith.constant 0 : index
    %c0_127 = arith.constant 0 : index
    %250 = vector.load %arg10[%c1_125, %c0_126, %c0_127] : memref<2x128x128xbf16, #tpu.memory_space<vmem>>, vector<1x128x128xbf16>
    %251 = vector.shape_cast %250 : vector<1x128x128xbf16> to vector<128x128xbf16>
    %cst_128 = arith.constant 0.000000e+00 : f32
    %252 = vector.broadcast %cst_128 : f32 to vector<2x128xf32>
    %cst_129 = arith.constant 0.000000e+00 : f32
    %253 = vector.broadcast %cst_129 : f32 to vector<2x128xf32>
    %c0_130 = arith.constant 0 : index
    %c0_131 = arith.constant 0 : index
    %c0_132 = arith.constant 0 : index
    %254 = vector.load %arg20[%c0_130, %c0_131, %c0_132] : memref<8x2x128xf32, #tpu.memory_space<vmem>>, vector<1x2x128xf32>
    %255 = vector.shape_cast %254 : vector<1x2x128xf32> to vector<2x128xf32>
    %256 = arith.truncf %252 : vector<2x128xf32> to vector<2x128xbf16>
    %cst_133 = arith.constant dense<0.000000e+00> : vector<2x128xf32>
    %257 = tpu.matmul %256, %251, %cst_133 {dimension_numbers = #tpu.dot_dimension_numbers<[1], [0], [0], [1], [0, 0, 1, 1], [], []>} : vector<2x128xbf16>, vector<128x128xbf16>, vector<2x128xf32> -> vector<2x128xf32>
    %258 = arith.addf %255, %257 : vector<2x128xf32>
    %259 = arith.mulf %258, %35 : vector<2x128xf32>
    %260 = math.tanh %259 : vector<2x128xf32>
    %261 = arith.mulf %260, %35 : vector<2x128xf32>
    %262 = arith.addf %261, %38 : vector<2x128xf32>
    %c64_i32_134 = arith.constant 64 : i32
    %263 = tpu.dynamic_rotate %262 by %c64_i32_134 dim 1 : vector<2x128xf32>, i32 -> vector<2x128xf32>
    %264 = arith.mulf %262, %263 : vector<2x128xf32>
    %c32_i32_135 = arith.constant 32 : i32
    %265 = tpu.dynamic_rotate %264 by %c32_i32_135 dim 1 : vector<2x128xf32>, i32 -> vector<2x128xf32>
    %266 = arith.mulf %262, %253 : vector<2x128xf32>
    %267 = arith.addf %265, %266 : vector<2x128xf32>
    %268 = math.tanh %267 : vector<2x128xf32>
    %269 = arith.mulf %263, %268 : vector<2x128xf32>
    %c1_136 = arith.constant 1 : index
    %c0_137 = arith.constant 0 : index
    %c0_138 = arith.constant 0 : index
    %270 = vector.load %arg20[%c1_136, %c0_137, %c0_138] : memref<8x2x128xf32, #tpu.memory_space<vmem>>, vector<1x2x128xf32>
    %271 = vector.shape_cast %270 : vector<1x2x128xf32> to vector<2x128xf32>
    %272 = arith.truncf %269 : vector<2x128xf32> to vector<2x128xbf16>
    %cst_139 = arith.constant dense<0.000000e+00> : vector<2x128xf32>
    %273 = tpu.matmul %272, %251, %cst_139 {dimension_numbers = #tpu.dot_dimension_numbers<[1], [0], [0], [1], [0, 0, 1, 1], [], []>} : vector<2x128xbf16>, vector<128x128xbf16>, vector<2x128xf32> -> vector<2x128xf32>
    %274 = arith.addf %271, %273 : vector<2x128xf32>
    %275 = arith.mulf %274, %35 : vector<2x128xf32>
    %276 = math.tanh %275 : vector<2x128xf32>
    %277 = arith.mulf %276, %35 : vector<2x128xf32>
    %278 = arith.addf %277, %38 : vector<2x128xf32>
    %c64_i32_140 = arith.constant 64 : i32
    %279 = tpu.dynamic_rotate %278 by %c64_i32_140 dim 1 : vector<2x128xf32>, i32 -> vector<2x128xf32>
    %280 = arith.mulf %278, %279 : vector<2x128xf32>
    %c32_i32_141 = arith.constant 32 : i32
    %281 = tpu.dynamic_rotate %280 by %c32_i32_141 dim 1 : vector<2x128xf32>, i32 -> vector<2x128xf32>
    %282 = arith.mulf %278, %267 : vector<2x128xf32>
    %283 = arith.addf %281, %282 : vector<2x128xf32>
    %284 = math.tanh %283 : vector<2x128xf32>
    %285 = arith.mulf %279, %284 : vector<2x128xf32>
    %c2_142 = arith.constant 2 : index
    %c0_143 = arith.constant 0 : index
    %c0_144 = arith.constant 0 : index
    %286 = vector.load %arg20[%c2_142, %c0_143, %c0_144] : memref<8x2x128xf32, #tpu.memory_space<vmem>>, vector<1x2x128xf32>
    %287 = vector.shape_cast %286 : vector<1x2x128xf32> to vector<2x128xf32>
    %288 = arith.truncf %285 : vector<2x128xf32> to vector<2x128xbf16>
    %cst_145 = arith.constant dense<0.000000e+00> : vector<2x128xf32>
    %289 = tpu.matmul %288, %251, %cst_145 {dimension_numbers = #tpu.dot_dimension_numbers<[1], [0], [0], [1], [0, 0, 1, 1], [], []>} : vector<2x128xbf16>, vector<128x128xbf16>, vector<2x128xf32> -> vector<2x128xf32>
    %290 = arith.addf %287, %289 : vector<2x128xf32>
    %291 = arith.mulf %290, %35 : vector<2x128xf32>
    %292 = math.tanh %291 : vector<2x128xf32>
    %293 = arith.mulf %292, %35 : vector<2x128xf32>
    %294 = arith.addf %293, %38 : vector<2x128xf32>
    %c64_i32_146 = arith.constant 64 : i32
    %295 = tpu.dynamic_rotate %294 by %c64_i32_146 dim 1 : vector<2x128xf32>, i32 -> vector<2x128xf32>
    %296 = arith.mulf %294, %295 : vector<2x128xf32>
    %c32_i32_147 = arith.constant 32 : i32
    %297 = tpu.dynamic_rotate %296 by %c32_i32_147 dim 1 : vector<2x128xf32>, i32 -> vector<2x128xf32>
    %298 = arith.mulf %294, %283 : vector<2x128xf32>
    %299 = arith.addf %297, %298 : vector<2x128xf32>
    %300 = math.tanh %299 : vector<2x128xf32>
    %301 = arith.mulf %295, %300 : vector<2x128xf32>
    %c3_148 = arith.constant 3 : index
    %c0_149 = arith.constant 0 : index
    %c0_150 = arith.constant 0 : index
    %302 = vector.load %arg20[%c3_148, %c0_149, %c0_150] : memref<8x2x128xf32, #tpu.memory_space<vmem>>, vector<1x2x128xf32>
    %303 = vector.shape_cast %302 : vector<1x2x128xf32> to vector<2x128xf32>
    %304 = arith.truncf %301 : vector<2x128xf32> to vector<2x128xbf16>
    %cst_151 = arith.constant dense<0.000000e+00> : vector<2x128xf32>
    %305 = tpu.matmul %304, %251, %cst_151 {dimension_numbers = #tpu.dot_dimension_numbers<[1], [0], [0], [1], [0, 0, 1, 1], [], []>} : vector<2x128xbf16>, vector<128x128xbf16>, vector<2x128xf32> -> vector<2x128xf32>
    %306 = arith.addf %303, %305 : vector<2x128xf32>
    %307 = arith.mulf %306, %35 : vector<2x128xf32>
    %308 = math.tanh %307 : vector<2x128xf32>
    %309 = arith.mulf %308, %35 : vector<2x128xf32>
    %310 = arith.addf %309, %38 : vector<2x128xf32>
    %c64_i32_152 = arith.constant 64 : i32
    %311 = tpu.dynamic_rotate %310 by %c64_i32_152 dim 1 : vector<2x128xf32>, i32 -> vector<2x128xf32>
    %312 = arith.mulf %310, %311 : vector<2x128xf32>
    %c32_i32_153 = arith.constant 32 : i32
    %313 = tpu.dynamic_rotate %312 by %c32_i32_153 dim 1 : vector<2x128xf32>, i32 -> vector<2x128xf32>
    %314 = arith.mulf %310, %299 : vector<2x128xf32>
    %315 = arith.addf %313, %314 : vector<2x128xf32>
    %316 = math.tanh %315 : vector<2x128xf32>
    %317 = arith.mulf %311, %316 : vector<2x128xf32>
    %c4_154 = arith.constant 4 : index
    %c0_155 = arith.constant 0 : index
    %c0_156 = arith.constant 0 : index
    %318 = vector.load %arg20[%c4_154, %c0_155, %c0_156] : memref<8x2x128xf32, #tpu.memory_space<vmem>>, vector<1x2x128xf32>
    %319 = vector.shape_cast %318 : vector<1x2x128xf32> to vector<2x128xf32>
    %320 = arith.truncf %317 : vector<2x128xf32> to vector<2x128xbf16>
    %cst_157 = arith.constant dense<0.000000e+00> : vector<2x128xf32>
    %321 = tpu.matmul %320, %251, %cst_157 {dimension_numbers = #tpu.dot_dimension_numbers<[1], [0], [0], [1], [0, 0, 1, 1], [], []>} : vector<2x128xbf16>, vector<128x128xbf16>, vector<2x128xf32> -> vector<2x128xf32>
    %322 = arith.addf %319, %321 : vector<2x128xf32>
    %323 = arith.mulf %322, %35 : vector<2x128xf32>
    %324 = math.tanh %323 : vector<2x128xf32>
    %325 = arith.mulf %324, %35 : vector<2x128xf32>
    %326 = arith.addf %325, %38 : vector<2x128xf32>
    %c64_i32_158 = arith.constant 64 : i32
    %327 = tpu.dynamic_rotate %326 by %c64_i32_158 dim 1 : vector<2x128xf32>, i32 -> vector<2x128xf32>
    %328 = arith.mulf %326, %327 : vector<2x128xf32>
    %c32_i32_159 = arith.constant 32 : i32
    %329 = tpu.dynamic_rotate %328 by %c32_i32_159 dim 1 : vector<2x128xf32>, i32 -> vector<2x128xf32>
    %330 = arith.mulf %326, %315 : vector<2x128xf32>
    %331 = arith.addf %329, %330 : vector<2x128xf32>
    %332 = math.tanh %331 : vector<2x128xf32>
    %333 = arith.mulf %327, %332 : vector<2x128xf32>
    %c5_160 = arith.constant 5 : index
    %c0_161 = arith.constant 0 : index
    %c0_162 = arith.constant 0 : index
    %334 = vector.load %arg20[%c5_160, %c0_161, %c0_162] : memref<8x2x128xf32, #tpu.memory_space<vmem>>, vector<1x2x128xf32>
    %335 = vector.shape_cast %334 : vector<1x2x128xf32> to vector<2x128xf32>
    %336 = arith.truncf %333 : vector<2x128xf32> to vector<2x128xbf16>
    %cst_163 = arith.constant dense<0.000000e+00> : vector<2x128xf32>
    %337 = tpu.matmul %336, %251, %cst_163 {dimension_numbers = #tpu.dot_dimension_numbers<[1], [0], [0], [1], [0, 0, 1, 1], [], []>} : vector<2x128xbf16>, vector<128x128xbf16>, vector<2x128xf32> -> vector<2x128xf32>
    %338 = arith.addf %335, %337 : vector<2x128xf32>
    %339 = arith.mulf %338, %35 : vector<2x128xf32>
    %340 = math.tanh %339 : vector<2x128xf32>
    %341 = arith.mulf %340, %35 : vector<2x128xf32>
    %342 = arith.addf %341, %38 : vector<2x128xf32>
    %c64_i32_164 = arith.constant 64 : i32
    %343 = tpu.dynamic_rotate %342 by %c64_i32_164 dim 1 : vector<2x128xf32>, i32 -> vector<2x128xf32>
    %344 = arith.mulf %342, %343 : vector<2x128xf32>
    %c32_i32_165 = arith.constant 32 : i32
    %345 = tpu.dynamic_rotate %344 by %c32_i32_165 dim 1 : vector<2x128xf32>, i32 -> vector<2x128xf32>
    %346 = arith.mulf %342, %331 : vector<2x128xf32>
    %347 = arith.addf %345, %346 : vector<2x128xf32>
    %348 = math.tanh %347 : vector<2x128xf32>
    %349 = arith.mulf %343, %348 : vector<2x128xf32>
    %c6_166 = arith.constant 6 : index
    %c0_167 = arith.constant 0 : index
    %c0_168 = arith.constant 0 : index
    %350 = vector.load %arg20[%c6_166, %c0_167, %c0_168] : memref<8x2x128xf32, #tpu.memory_space<vmem>>, vector<1x2x128xf32>
    %351 = vector.shape_cast %350 : vector<1x2x128xf32> to vector<2x128xf32>
    %352 = arith.truncf %349 : vector<2x128xf32> to vector<2x128xbf16>
    %cst_169 = arith.constant dense<0.000000e+00> : vector<2x128xf32>
    %353 = tpu.matmul %352, %251, %cst_169 {dimension_numbers = #tpu.dot_dimension_numbers<[1], [0], [0], [1], [0, 0, 1, 1], [], []>} : vector<2x128xbf16>, vector<128x128xbf16>, vector<2x128xf32> -> vector<2x128xf32>
    %354 = arith.addf %351, %353 : vector<2x128xf32>
    %355 = arith.mulf %354, %35 : vector<2x128xf32>
    %356 = math.tanh %355 : vector<2x128xf32>
    %357 = arith.mulf %356, %35 : vector<2x128xf32>
    %358 = arith.addf %357, %38 : vector<2x128xf32>
    %c64_i32_170 = arith.constant 64 : i32
    %359 = tpu.dynamic_rotate %358 by %c64_i32_170 dim 1 : vector<2x128xf32>, i32 -> vector<2x128xf32>
    %360 = arith.mulf %358, %359 : vector<2x128xf32>
    %c32_i32_171 = arith.constant 32 : i32
    %361 = tpu.dynamic_rotate %360 by %c32_i32_171 dim 1 : vector<2x128xf32>, i32 -> vector<2x128xf32>
    %362 = arith.mulf %358, %347 : vector<2x128xf32>
    %363 = arith.addf %361, %362 : vector<2x128xf32>
    %364 = math.tanh %363 : vector<2x128xf32>
    %365 = arith.mulf %359, %364 : vector<2x128xf32>
    %c7_172 = arith.constant 7 : index
    %c0_173 = arith.constant 0 : index
    %c0_174 = arith.constant 0 : index
    %366 = vector.load %arg20[%c7_172, %c0_173, %c0_174] : memref<8x2x128xf32, #tpu.memory_space<vmem>>, vector<1x2x128xf32>
    %367 = vector.shape_cast %366 : vector<1x2x128xf32> to vector<2x128xf32>
    %368 = arith.truncf %365 : vector<2x128xf32> to vector<2x128xbf16>
    %cst_175 = arith.constant dense<0.000000e+00> : vector<2x128xf32>
    %369 = tpu.matmul %368, %251, %cst_175 {dimension_numbers = #tpu.dot_dimension_numbers<[1], [0], [0], [1], [0, 0, 1, 1], [], []>} : vector<2x128xbf16>, vector<128x128xbf16>, vector<2x128xf32> -> vector<2x128xf32>
    %370 = arith.addf %367, %369 : vector<2x128xf32>
    %371 = arith.mulf %370, %35 : vector<2x128xf32>
    %372 = math.tanh %371 : vector<2x128xf32>
    %373 = arith.mulf %372, %35 : vector<2x128xf32>
    %374 = arith.addf %373, %38 : vector<2x128xf32>
    %c64_i32_176 = arith.constant 64 : i32
    %375 = tpu.dynamic_rotate %374 by %c64_i32_176 dim 1 : vector<2x128xf32>, i32 -> vector<2x128xf32>
    %376 = arith.mulf %374, %375 : vector<2x128xf32>
    %c32_i32_177 = arith.constant 32 : i32
    %377 = tpu.dynamic_rotate %376 by %c32_i32_177 dim 1 : vector<2x128xf32>, i32 -> vector<2x128xf32>
    %378 = arith.mulf %374, %363 : vector<2x128xf32>
    %379 = arith.addf %377, %378 : vector<2x128xf32>
    %380 = math.tanh %379 : vector<2x128xf32>
    %381 = arith.mulf %375, %380 : vector<2x128xf32>
    %c0_178 = arith.constant 0 : index
    %c0_179 = arith.constant 0 : index
    %382 = vector.load %arg1[%c0_178, %c0_179] : memref<2x5xf32, #tpu.memory_space<vmem>>, vector<2x5xf32>
    %383 = vector.extract_strided_slice %382 {offsets = [0, 4], sizes = [2, 1], strides = [1, 1]} : vector<2x5xf32> to vector<2x1xf32>
    %c0_180 = arith.constant 0 : index
    %c0_181 = arith.constant 0 : index
    %384 = vector.load %arg12[%c0_180, %c0_181] : memref<1x4xf32, #tpu.memory_space<vmem>>, vector<1x4xf32>
    %385 = vector.broadcast %383 : vector<2x1xf32> to vector<2x4xf32>
    %386 = vector.broadcast %384 : vector<1x4xf32> to vector<2x4xf32>
    %387 = arith.mulf %385, %386 : vector<2x4xf32>
    %388 = vector.extract_strided_slice %382 {offsets = [0, 0], sizes = [2, 4], strides = [1, 1]} : vector<2x5xf32> to vector<2x4xf32>
    %389 = math.sin %387 : vector<2x4xf32>
    %390 = math.cos %387 : vector<2x4xf32>
    %391 = tpu.concatenate %381, %388, %389, %390 in 1 : vector<2x128xf32>, vector<2x4xf32>, vector<2x4xf32>, vector<2x4xf32> -> vector<2x140xf32>
    %c0_182 = arith.constant 0 : index
    %c0_183 = arith.constant 0 : index
    %392 = vector.load %arg13[%c0_182, %c0_183] : memref<140x32xbf16, #tpu.memory_space<vmem>>, vector<140x32xbf16>
    %393 = arith.truncf %391 : vector<2x140xf32> to vector<2x140xbf16>
    %cst_184 = arith.constant dense<0.000000e+00> : vector<2x32xf32>
    %394 = tpu.matmul %393, %392, %cst_184 {dimension_numbers = #tpu.dot_dimension_numbers<[1], [0], [0], [1], [0, 0, 1, 1], [], []>} : vector<2x140xbf16>, vector<140x32xbf16>, vector<2x32xf32> -> vector<2x32xf32>
    %c0_185 = arith.constant 0 : index
    %c0_186 = arith.constant 0 : index
    %395 = vector.load %arg14[%c0_185, %c0_186] : memref<1x32xf32, #tpu.memory_space<vmem>>, vector<1x32xf32>
    %396 = vector.broadcast %395 : vector<1x32xf32> to vector<2x32xf32>
    %397 = arith.addf %394, %396 : vector<2x32xf32>
    %cst_187 = arith.constant 0.000000e+00 : f32
    %398 = vector.broadcast %cst_187 : f32 to vector<2x32xf32>
    %399 = arith.cmpf oge, %397, %398 : vector<2x32xf32>
    %400 = vector.broadcast %2 : f32 to vector<2x32xf32>
    %401 = arith.mulf %400, %397 : vector<2x32xf32>
    %402 = arith.select %399, %397, %401 : vector<2x32xi1>, vector<2x32xf32>
    %c0_188 = arith.constant 0 : index
    %c0_189 = arith.constant 0 : index
    %403 = vector.load %arg15[%c0_188, %c0_189] : memref<32x32xbf16, #tpu.memory_space<vmem>>, vector<32x32xbf16>
    %404 = arith.truncf %402 : vector<2x32xf32> to vector<2x32xbf16>
    %cst_190 = arith.constant dense<0.000000e+00> : vector<2x32xf32>
    %405 = tpu.matmul %404, %403, %cst_190 {dimension_numbers = #tpu.dot_dimension_numbers<[1], [0], [0], [1], [0, 0, 1, 1], [], []>} : vector<2x32xbf16>, vector<32x32xbf16>, vector<2x32xf32> -> vector<2x32xf32>
    %c0_191 = arith.constant 0 : index
    %c0_192 = arith.constant 0 : index
    %406 = vector.load %arg16[%c0_191, %c0_192] : memref<1x32xf32, #tpu.memory_space<vmem>>, vector<1x32xf32>
    %407 = vector.broadcast %406 : vector<1x32xf32> to vector<2x32xf32>
    %408 = arith.addf %405, %407 : vector<2x32xf32>
    %cst_193 = arith.constant 0.000000e+00 : f32
    %409 = vector.broadcast %cst_193 : f32 to vector<2x32xf32>
    %410 = arith.cmpf oge, %408, %409 : vector<2x32xf32>
    %411 = vector.broadcast %3 : f32 to vector<2x32xf32>
    %412 = arith.mulf %411, %408 : vector<2x32xf32>
    %413 = arith.select %410, %408, %412 : vector<2x32xi1>, vector<2x32xf32>
    %c0_194 = arith.constant 0 : index
    %c0_195 = arith.constant 0 : index
    %414 = vector.load %arg17[%c0_194, %c0_195] : memref<32x8xbf16, #tpu.memory_space<vmem>>, vector<32x8xbf16>
    %415 = arith.truncf %413 : vector<2x32xf32> to vector<2x32xbf16>
    %cst_196 = arith.constant dense<0.000000e+00> : vector<2x8xf32>
    %416 = tpu.matmul %415, %414, %cst_196 {dimension_numbers = #tpu.dot_dimension_numbers<[1], [0], [0], [1], [0, 0, 1, 1], [], []>} : vector<2x32xbf16>, vector<32x8xbf16>, vector<2x8xf32> -> vector<2x8xf32>
    %c0_197 = arith.constant 0 : index
    %c0_198 = arith.constant 0 : index
    %417 = vector.load %arg18[%c0_197, %c0_198] : memref<1x8xf32, #tpu.memory_space<vmem>>, vector<1x8xf32>
    %418 = vector.broadcast %417 : vector<1x8xf32> to vector<2x8xf32>
    %419 = arith.addf %416, %418 : vector<2x8xf32>
    %c0_199 = arith.constant 0 : index
    %c0_200 = arith.constant 0 : index
    %420 = vector.load %arg19[%c0_199, %c0_200] : memref<2x8xf32, #tpu.memory_space<vmem>>, vector<2x8xf32>
    tpu.vector_store %arg19[%c0_199, %c0_200], %419 {strides = array<i32>} : memref<2x8xf32, #tpu.memory_space<vmem>>, vector<2x8xf32>,
    return
  }
}

</mosaic_0001>

<bundles_post_ra>
// kernel: tpu_custom_call.1
= control target key start
LH: loop header
LB: loop body
LE: loop exit
PB: predicated region body
PF: predicated region fallthrough
CT: control target
= control target key end

     0   :  { %s3935_s0 = inlined_call_operand.vmem [shape: f32[16,4], index: 0, kind: input, shape index: {}]   ;;  %s3936_s1 = inlined_call_operand.hbm [shape: f32[2,5], index: 1, kind: input, shape index: {}]   ;;  %s3937_s2 = inlined_call_operand.hbm [shape: f32[4], index: 2, kind: input, shape index: {}]   ;;  %s3938_s3 = inlined_call_operand.hbm [shape: bf16[4,64], index: 3, kind: input, shape index: {}]   ;;  %s3939_s4 = inlined_call_operand.hbm [shape: f32[1,64], index: 4, kind: input, shape index: {}]   ;;  %s3940_s5 = inlined_call_operand.vmem [shape: bf16[64,64], index: 5, kind: input, shape index: {}]   ;;  %s3941_s6 = inlined_call_operand.hbm [shape: f32[1,64], index: 6, kind: input, shape index: {}]   ;;  %s3942_s7 = inlined_call_operand.hbm [shape: bf16[64,128], index: 7, kind: input, shape index: {}]   ;;  %s3943_s8 = inlined_call_operand.hbm [shape: f32[1,128], index: 8, kind: input, shape index: {}]   ;;  %s3944_s9 = inlined_call_operand.vmem [shape: bf16[2,128,128], index: 9, kind: input, shape index: {}]   ;;  %s3945_s10 = inlined_call_operand.hbm [shape: bf16[2,128,128], index: 10, kind: input, shape index: {}]   ;;  %s3946_s11 = inlined_call_operand.hbm [shape: f32[2,1,128], index: 11, kind: input, shape index: {}]   ;;  %s3947_s12 = inlined_call_operand.vmem [shape: f32[1,4], index: 12, kind: input, shape index: {}]   ;;  %s3948_s13 = inlined_call_operand.vmem [shape: bf16[140,32], index: 13, kind: input, shape index: {}]   ;;  %s3949_s14 = inlined_call_operand.vmem [shape: f32[1,32], index: 14, kind: input, shape index: {}]   ;;  %s3950_s15 = inlined_call_operand.hbm [shape: bf16[32,32], index: 15, kind: input, shape index: {}]   ;;  %s3951_s16 = inlined_call_operand.vmem [shape: f32[1,32], index: 16, kind: input, shape index: {}]   ;;  %s3952_s17 = inlined_call_operand.vmem [shape: bf16[32,8], index: 17, kind: input, shape index: {}]   ;;  %s3953_s18 = inlined_call_operand.vmem [shape: f32[1,8], index: 18, kind: input, shape index: {}]   ;;  %s3954_s19 = inlined_call_operand.hbm [shape: f32[2,8], index: 19, kind: output, shape index: {}]  }
   0x1   :  { %3956 = sst [smem:[#allocation28_spill]] %s3935_s0 }
   0x2   :  { %3957 = sst [smem:[#allocation29_spill]] %s3936_s1 }
   0x3   :  { %3958 = sst [smem:[#allocation30_spill]] %s3937_s2 }
   0x4   :  { %3959 = sst [smem:[#allocation31_spill]] %s3938_s3 }
   0x5   :  { %24 = vsyncpa [#allocation4], 0 }
   0x6   :  { %25 = vsyncpa [#allocation6], 0 }
   0x7   :  { %26 = vsyncpa [#allocation9], 0 }
   0x8   :  { %27 = vsyncpa [#allocation12], 0 }
   0x9   :  { %28 = vsyncpa [#allocation15], 0 }
   0xa   :  { %29 = vsyncpa [#allocation18], 0 }
   0xb   :  { %30 = vsyncpa [#allocation5], 0  ;;  %s3163_s0 = smov [#allocation8]   ;;  %s3164_s20 = smov [#allocation11]  }
   0xc   :  { %s57_s30 = sshll.u32 %s3163_s0, 4  ;;  %s79_s21 = sshll.u32 %s3164_s20, 4  ;;  %s58_s30 = int_to_ptr.vmem [resolvable:$true] %s57_s30  ;;  %s80_s21 = int_to_ptr.vmem [resolvable:$true] %s79_s21 }
   0xd   :  { %s2949_s1 = scalar_lea.vmem %s58_s30, 32  ;;  %p2954_p1 = scmp.lt.s32.totalorder %s58_s30, %s58_s30 }
   0xe   :  { %p2950_p0 = scmp.ne.s32.totalorder %s58_s30, %s2949_s1  ;;  %p2955_p2 = scmp.lt.s32.totalorder %s2949_s1, %s2949_s1 }
  0x10   :  { %p2956_p3 = por %p2955_p2, %p2954_p1 }
  0x12   :  { %p2957_p4 = pnand %p2956_p3, %p2950_p0 }
  0x14   :  { %2960 = shalt.err (!%p2957_p4)
}
  0x15   :  { %s3960_s23 = sld [smem:[#allocation31_spill]]  ;;  %s2969_s24 = scalar_lea.vmem %s80_s21, 16 }
  0x16   :  { %p2970_p5 = scmp.ne.s32.totalorder %s80_s21, %s2969_s24  ;;  %s2973_s25 = scalar_lea.vmem %s80_s21, 32 }
  0x17   :  { %p2974_p6 = scmp.lt.s32.totalorder %s80_s21, %s80_s21  ;;  %p2975_p7 = scmp.lt.s32.totalorder %s2973_s25, %s2969_s24 }
  0x19   :  { %p2976_p8 = por %p2975_p7, %p2974_p6 }
  0x1b   :  { %60 = dma.hbm_to_vmem [thread:$0]  %s3960_s23, 32, %s58_s30, [#allocation9]  }
  0x1c   :  { %p2977_p9 = pnand %p2976_p8, %p2970_p5 }
  0x1e   :  { %2980 = shalt.err (!%p2977_p9)
}
  0x1f   :  { %82 = dma.hbm_to_vmem [thread:$0]  %s3941_s6, 16, %s80_s21, [#allocation12]  }
  0x20   :  { %s3165_s27 = smov [#allocation14]   ;;  %s3166_s29 = smov [#allocation17]  }
  0x21   :  { %s101_s28 = sshll.u32 %s3165_s27, 4  ;;  %s124_s0 = sshll.u32 %s3166_s29, 4  ;;  %s102_s28 = int_to_ptr.vmem [resolvable:$true] %s101_s28  ;;  %s125_s0 = int_to_ptr.vmem [resolvable:$true] %s124_s0 }
  0x22   :  { %s2989_s20 = scalar_lea.vmem %s102_s28, 16  ;;  %s2993_s30 = scalar_lea.vmem %s102_s28, 32 }
  0x23   :  { %p2990_p10 = scmp.ne.s32.totalorder %s102_s28, %s2989_s20  ;;  %p2994_p11 = scmp.lt.s32.totalorder %s102_s28, %s102_s28 }
  0x24   :  { %p2995_p12 = scmp.lt.s32.totalorder %s2993_s30, %s2989_s20 }
  0x26   :  { %p2996_p13 = por %p2995_p12, %p2994_p11 }
  0x28   :  { %p2997_p0 = pnand %p2996_p13, %p2990_p10 }
  0x2a   :  { %3000 = shalt.err (!%p2997_p0)
}
  0x2b   :  { %104 = dma.hbm_to_vmem [thread:$0]  %s3943_s8, 16, %s102_s28, [#allocation15]  }
  0x2c   :  { %s3009_s2 = scalar_lea.vmem %s125_s0, 32  ;;  %p3014_p2 = scmp.lt.s32.totalorder %s125_s0, %s125_s0 }
  0x2d   :  { %p3010_p1 = scmp.ne.s32.totalorder %s125_s0, %s3009_s2  ;;  %p3015_p3 = scmp.lt.s32.totalorder %s3009_s2, %s3009_s2 }
  0x2f   :  { %p3016_p4 = por %p3015_p3, %p3014_p2 }
  0x31   :  { %p3017_p5 = pnand %p3016_p4, %p3010_p1 }
  0x33   :  { %3020 = shalt.err (!%p3017_p5)
}
  0x34   :  { %s3167_s6 = smov 16   ;;  %s3168_s21 = smov 1  }
  0x35   :  { %130 = dma.hbm_to_vmem [thread:$0]  %s3946_s11, 32, %s125_s0, [#allocation18], %s3167_s6, %s3167_s6, %s3168_s21  }
  0x36   :  { %s3169_s25 = smov [#allocation3]   ;;  %s3170_s26 = smov [#allocation10]  }
  0x37   :  { %s39_s3 = sshll.u32 %s3169_s25, 4  ;;  %s67_s27 = sshll.u32 %s3170_s26, 4  ;;  %s40_s3 = int_to_ptr.vmem [resolvable:$true] %s39_s3  ;;  %s68_s27 = int_to_ptr.vmem [resolvable:$true] %s67_s27 }
  0x38   :  { %s3029_s29 = scalar_lea.vmem %s40_s3, 32  ;;  %p3034_p7 = scmp.lt.s32.totalorder %s40_s3, %s40_s3 }
  0x39   :  { %p3030_p6 = scmp.ne.s32.totalorder %s40_s3, %s3029_s29  ;;  %p3035_p8 = scmp.lt.s32.totalorder %s3029_s29, %s3029_s29 }
  0x3b   :  { %p3036_p9 = por %p3035_p8, %p3034_p7 }
  0x3d   :  { %p3037_p10 = pnand %p3036_p9, %p3030_p6 }
  0x3f   :  { %3040 = shalt.err (!%p3037_p10)
}
  0x40   :  { %s3961_s20 = sld [smem:[#allocation29_spill]]  ;;  %s3171_s30 = smov [#allocation7]  }
  0x41   :  { %s3962_s11 = sld [smem:[#allocation30_spill]]  ;;  %s3057_s0 = scalar_lea.vmem %s68_s27, 16 }
  0x42   :  { %p3058_p11 = scmp.ne.s32.totalorder %s68_s27, %s3057_s0  ;;  %s3061_s2 = scalar_lea.vmem %s68_s27, 32 }
  0x43   :  { %p3062_p12 = scmp.lt.s32.totalorder %s68_s27, %s68_s27  ;;  %p3063_p13 = scmp.lt.s32.totalorder %s3061_s2, %s3057_s0 }
  0x45   :  { %p3064_p0 = por %p3063_p13, %p3062_p12 }
  0x46   :  { %42 = dma.hbm_to_vmem [thread:$0]  %s3961_s20, 32, %s40_s3, [#allocation4]  }
  0x47   :  { %50 = dma.hbm_to_smem %s3962_s11, 16, %s3171_s30, [#allocation6]  }
  0x48   :  { %p3065_p1 = pnand %p3064_p0, %p3058_p11 }
  0x4a   :  { %3068 = shalt.err (!%p3065_p1)
}
  0x4b   :  { %70 = dma.hbm_to_vmem [thread:$0]  %s3939_s4, 16, %s68_s27, [#allocation9]  }
  0x4c   :  { %s3172_s23 = smov [#allocation13]  }
  0x4d   :  { %s88_s24 = sshll.u32 %s3172_s23, 4  ;;  %s89_s24 = int_to_ptr.vmem [resolvable:$true] %s88_s24 }
  0x4e   :  { %s3077_s25 = scalar_lea.vmem %s89_s24, 512  ;;  %p3082_p3 = scmp.lt.s32.totalorder %s89_s24, %s89_s24 }
  0x4f   :  { %p3078_p2 = scmp.ne.s32.totalorder %s89_s24, %s3077_s25  ;;  %p3083_p4 = scmp.lt.s32.totalorder %s3077_s25, %s3077_s25 }
  0x51   :  { %p3084_p5 = por %p3083_p4, %p3082_p3 }
  0x53   :  { %p3085_p6 = pnand %p3084_p5, %p3078_p2 }
  0x55   :  { %3088 = shalt.err (!%p3085_p6)
}
  0x56   :  { %s3173_s3 = smov 64   ;;  %s3174_s26 = smov 4  }
  0x57   :  { %94 = dma.hbm_to_vmem [thread:$0]  %s3942_s7, 512, %s89_s24, [#allocation12], %s3173_s3, %s3173_s3, %s3174_s26  }
  0x58   :  { %s3175_s4 = smov [#allocation16]   ;;  %s3176_s28 = smov [#allocation19]  }
  0x59   :  { %s112_s27 = sshll.u32 %s3175_s4, 4  ;;  %s142_s20 = sshll.u32 %s3176_s28, 4  ;;  %s113_s27 = int_to_ptr.vmem [resolvable:$true] %s112_s27  ;;  %s143_s20 = int_to_ptr.vmem [resolvable:$true] %s142_s20 }
  0x5a   :  { %s3097_s30 = scalar_lea.vmem %s113_s27, 2048  ;;  %p3102_p8 = scmp.lt.s32.totalorder %s113_s27, %s113_s27 }
  0x5b   :  { %p3098_p7 = scmp.ne.s32.totalorder %s113_s27, %s3097_s30  ;;  %p3103_p9 = scmp.lt.s32.totalorder %s3097_s30, %s3097_s30 }
  0x5d   :  { %p3104_p10 = por %p3103_p9, %p3102_p8 }
  0x5f   :  { %p3105_p11 = pnand %p3104_p10, %p3098_p7 }
  0x61   :  { %3108 = shalt.err (!%p3105_p11)
}
  0x62   :  { %118 = dma.hbm_to_vmem [thread:$0]  %s3945_s10, 2048, %s113_s27, [#allocation15], %s3173_s3, %s3173_s3, %s3174_s26  }
  0x63   :  { %s3117_s7 = scalar_lea.vmem %s143_s20, 256  ;;  %p3122_p13 = scmp.lt.s32.totalorder %s143_s20, %s143_s20 }
  0x64   :  { %p3118_p12 = scmp.ne.s32.totalorder %s143_s20, %s3117_s7  ;;  %p3123_p0 = scmp.lt.s32.totalorder %s3117_s7, %s3117_s7 }
  0x66   :  { %p3124_p1 = por %p3123_p0, %p3122_p13 }
  0x68   :  { %p3125_p2 = pnand %p3124_p1, %p3118_p12 }
  0x6a   :  { %3128 = shalt.err (!%p3125_p2)
}
  0x6b   :  { %148 = dma.hbm_to_vmem [thread:$0]  %s3950_s15, 256, %s143_s20, [#allocation18], %s3173_s3, %s3173_s3, %s3174_s26  }
  0x6c   :  { %3149 = dma.done.wait [#allocation4], 32  }
  0x6d   :  { %3150 = vsyncadd [#allocation4], 4294967264 }
  0x6e   :  { %3151 = dma.done.wait [#allocation6], 16  }
  0x6f   :  { %3152 = vsyncadd [#allocation6], 4294967280 }
  0x70   :  { %3153 = dma.done.wait [#allocation9], 48  }
  0x71   :  { %3154 = vsyncadd [#allocation9], 4294967248 }
  0x72   :  { %3155 = dma.done.wait [#allocation12], 528  }
  0x73   :  { %3156 = vsyncadd [#allocation12], 4294966768 }
  0x74   :  { %3157 = dma.done.wait [#allocation15], 2064  }
  0x75   :  { %3158 = vsyncadd [#allocation15], 4294965232 }
  0x76   :  { %3159 = dma.done.wait [#allocation18], 288  }
  0x77   :  { %3160 = vsyncadd [#allocation18], 4294967008 }
  0x78   :  { %185 = sfence }
  0x79   :  { %v193_v0 = vld [vmem:[#allocation8] sm:$0x3]  ;;  %vm206_vm0 = vcmask 1041408   ;;  %s3963_s6 = sld [smem:[#allocation28_spill]]  ;;  %v3177_v2 = vmov 0.0   ;;  %vm3178_vm1 = vmmov 0   ;;  %v350_v53 = vlaneseq }
  0x7a   :  { %2409 = vmatprep.subr.bf16.mxu1 %v3177_v2  ;;  %v208_v3 = vsel %vm206_vm0, %v193_v0, 0  ;;  %2411 = vmatprep.mubr.msk.bf16.mxu1 %vm3178_vm1, %v3177_v2  ;;  %vm202_vm2 = vcmask 31744   ;;  %v2828_v6 = vld [vmem:[%s3940_s5 + $0x18] sm:$0xff]   ;;  %v2829_v7 = vld [vmem:[%s3940_s5 + $0x10] sm:$0xff]   ;;  %v2830_v8 = vld [vmem:[%s3940_s5 + $0x8] sm:$0xff]   ;;  %s187_s20 = sld [smem:[#allocation7]] }
  0x7b   :  { %2410 = vmatpush3.bf16.msra.mxu1 %v208_v3  ;;  %2427 = vmatprep.subr.bf16.mxu0 %v3177_v2  ;;  %v2831_v9 = vld [vmem:[%s3940_s5] sm:$0xff]   ;;  %v2835_v10 = vld [vmem:[#allocation13 + $0x18] sm:$0xff]   ;;  %vm298_vm5 = vcmask 523264   ;;  %v2837_v28 = vld [vmem:[#allocation13 + $0x10] sm:$0xff]   ;;  %v3179_v35 = vmov 0   ;;  %s2152_s5 = sld [smem:[#allocation7 + $0x1]] }
  0x7c   :  { %2415 = vmatprep.subr.bf16.mxu1 %v3177_v2  ;;  %2435 = vmatprep.mubr.msk.bf16.mxu0 %vm3178_vm1, %v3177_v2  ;;  %v2155_v11 = vld [vmem:[#allocation10] ss:$0 sm:$0xff]  ;;  %v3368_v25 = vld [vmem:[#allocation16 + $0x30] sm:$0xff]   ;;  %v3374_v26 = vld [vmem:[#allocation16 + $0x28] sm:$0xff]   ;;  %v351_v56 = vand.u32 127, %v350_v53  ;;  %v3180_v62 = vmov 0.5  }
  0x7d   :  { %2428 = vmatpush3.bf16.msra.mxu0 %v2835_v10  ;;  %v3364_v23 = vld [vmem:[#allocation16 + $0x38] sm:$0xff]   ;;  %v3378_v27 = vld [vmem:[#allocation16 + $0x20] sm:$0xff]   ;;  %v3388_v31 = vld [vmem:[#allocation16 + $0x10] sm:$0xff]   ;;  %s3181_s30 = smov 32   ;;  %vm986_vm11 = vcmask 1043456   ;;  %vm988_vm12 = vcmask 1045504  }
  0x7e   :  { %2429 = vmatprep.subr.bf16.mxu0 %v3177_v2  ;;  %v3383_v29 = vld [vmem:[#allocation16 + $0x18] sm:$0xff]   ;;  %v2839_v30 = vld [vmem:[#allocation13 + $0x8] sm:$0xff]   ;;  %vm352_vm8 = vcmp.ge.s32.totalorder %v351_v56, 64  ;;  %vm353_vm9 = vcmp.lt.s32.totalorder %v351_v56, 96  ;;  %s3189_s25 = smov 8   ;;  %s2154_s27 = sld [smem:[#allocation7 + $0x3]] }
  0x7f   :  { %v191_v1 = vld [vmem:[%s3963_s6] sm:$0xff]  ;;  %v192_v4 = vld [vmem:[%s3963_s6 + $0x8] sm:$0xff]  ;;  %v2841_v32 = vld [vmem:[#allocation13] sm:$0xff]  }
  0x80   :  { %v194_v5 = vpack.c.bf16 %v192_v4, %v191_v1  ;;  %v253_v14 = vstv %s187_s20  ;;  %v3393_v33 = vld [vmem:[#allocation16 + $0x8] sm:$0xff]   ;;  %v3398_v34 = vld [vmem:[#allocation16] sm:$0xff]   ;;  %v2157_v36 = vld [vmem:[#allocation11] ss:$0 sm:$0xff] }
  0x81   :  { %2430 = vmatpush3.bf16.msra.mxu0 %v2837_v28  ;;  %v345_v39 = vstv %s2152_s5  ;;  %v2163_v54 = vld [vmem:[#allocation14] ss:$0 sm:$0xff]  ;;  %vm354_vm10 = vmand %vm352_vm8, %vm353_vm9  ;;  %s3190_s5 = smov [#allocation20]  }
  0x82   :  { %2412 = vmatmul.mubr.msk.bf16.vlgmr.msra.gmra.mxu1 %vm202_vm2, %v194_v5  ;;  %2431 = vmatprep.subr.bf16.mxu0 %v3177_v2  ;;  %v3440_v63 = vsel %vm354_vm10, 1.0, %v3180_v62  ;;  %v3443_v5 = vsel %vm354_vm10, 0.0, %v3180_v62 }
  0x83   :  { %2416 = vmatpush3.bf16.msra.mxu1 %v2828_v6  ;;  %2423 = vmatprep.mubr.msk.bf16.mxu1 %vm3178_vm1, %v3177_v2 }
  0x84   :  { %2417 = vmatprep.subr.bf16.mxu1 %v3177_v2 }
  0x85   :  { %2432 = vmatpush3.bf16.msra.mxu0 %v2839_v30 }
  0x86   :  { %2433 = vmatprep.subr.bf16.mxu0 %v3177_v2 }
  0x87   :  { %2418 = vmatpush3.bf16.msra.mxu1 %v2829_v7 }
  0x88   :  { %2419 = vmatprep.subr.bf16.mxu1 %v3177_v2 }
  0x89   :  { %2434 = vmatpush3.bf16.msra.mxu0 %v2841_v32 }
  0x8a   :  { %2459 = vmatprep.subr.bf16.mxu0 %v3177_v2 }
  0x8b   :  { %2420 = vmatpush3.bf16.msra.mxu1 %v2830_v8 }
  0x8c   :  { %2421 = vmatprep.subr.bf16.mxu1 %v3177_v2 }
  0x8f   :  { %2422 = vmatpush3.bf16.msra.mxu1 %v2831_v9 }
  0x90   :  { %2439 = vmatprep.subr.bf16.mxu1 %v3177_v2 }
 0x142   :  { %v244_v12 = vpop.f32.mrf.mxu1 }
 0x143   :  { %v245_v13 = vadd.f32 %v2155_v11, %v244_v12 }
 0x144   :  { %v2413_v15 = vpop.f32.mrf.mxu1 }
 0x145   :  { %v254_v17 = vmul.f32 %v253_v14, %v245_v13  ;;  %vm251_vm3 = vcmp.ge.f32.partialorder %v245_v13, 0.0 }
 0x146   :  { %v247_v16 = vpop.f32.mrf.mxu1 }
 0x147   :  { %v248_v18 = vadd.f32 %v2155_v11, %v247_v16  ;;  %v256_v21 = vsel %vm251_vm3, %v245_v13, %v254_v17 }
 0x148   :  { %v2414_v19 = vpop.f32.mrf.mxu1 }
 0x149   :  { %vm252_vm4 = vcmp.ge.f32.partialorder %v248_v18, 0.0  ;;  %v255_v20 = vmul.f32 %v253_v14, %v248_v18 }
 0x14b   :  { %v257_v22 = vsel %vm252_vm4, %v248_v18, %v255_v20 }
 0x14c   :  { %v266_v24 = vpack.c.bf16 %v257_v22, %v256_v21 }
 0x14e   :  { %2424 = vmatmul.mubr.msk.bf16.vlgmr.msra.gmra.mxu1 %vm298_vm5, %v266_v24 }
 0x14f   :  { %2440 = vmatpush3.bf16.msra.mxu1 %v3364_v23  ;;  %2455 = vmatprep.mubr.msk.bf16.mxu1 %vm3178_vm1, %v3177_v2 }
 0x150   :  { %2441 = vmatprep.subr.bf16.mxu1 %v3177_v2 }
 0x153   :  { %2442 = vmatpush3.bf16.msra.mxu1 %v3368_v25 }
 0x154   :  { %2443 = vmatprep.subr.bf16.mxu1 %v3177_v2 }
 0x157   :  { %2444 = vmatpush3.bf16.msra.mxu1 %v3374_v26 }
 0x158   :  { %2445 = vmatprep.subr.bf16.mxu1 %v3177_v2 }
 0x15b   :  { %2446 = vmatpush3.bf16.msra.mxu1 %v3378_v27 }
 0x15c   :  { %2447 = vmatprep.subr.bf16.mxu1 %v3177_v2 }
 0x15f   :  { %2448 = vmatpush3.bf16.msra.mxu1 %v3383_v29 }
 0x160   :  { %2449 = vmatprep.subr.bf16.mxu1 %v3177_v2 }
 0x163   :  { %2450 = vmatpush3.bf16.msra.mxu1 %v3388_v31 }
 0x164   :  { %2451 = vmatprep.subr.bf16.mxu1 %v3177_v2 }
 0x167   :  { %2452 = vmatpush3.bf16.msra.mxu1 %v3393_v33 }
 0x168   :  { %2453 = vmatprep.subr.bf16.mxu1 %v3177_v2 }
 0x16b   :  { %2454 = vmatpush3.bf16.msra.mxu1 %v3398_v34 }
 0x16c   :  { %2479 = vmatprep.subr.bf16.mxu1 %v3177_v2 }
 0x16e   :  { %2456 = vmatmul.mubr.bf16.vlgmr.msra.gmra.mxu1 %v3179_v35 }
 0x16f   :  { %2480 = vmatpush3.bf16.msra.mxu1 %v3364_v23  ;;  %2495 = vmatprep.mubr.msk.bf16.mxu1 %vm3178_vm1, %v3177_v2 }
 0x170   :  { %2481 = vmatprep.subr.bf16.mxu1 %v3177_v2 }
 0x173   :  { %2482 = vmatpush3.bf16.msra.mxu1 %v3368_v25 }
 0x174   :  { %2483 = vmatprep.subr.bf16.mxu1 %v3177_v2 }
 0x177   :  { %2484 = vmatpush3.bf16.msra.mxu1 %v3374_v26 }
 0x178   :  { %2485 = vmatprep.subr.bf16.mxu1 %v3177_v2 }
 0x17b   :  { %2486 = vmatpush3.bf16.msra.mxu1 %v3378_v27 }
 0x17c   :  { %2487 = vmatprep.subr.bf16.mxu1 %v3177_v2 }
 0x17f   :  { %2488 = vmatpush3.bf16.msra.mxu1 %v3383_v29 }
 0x180   :  { %2489 = vmatprep.subr.bf16.mxu1 %v3177_v2 }
 0x183   :  { %2490 = vmatpush3.bf16.msra.mxu1 %v3388_v31 }
 0x184   :  { %2491 = vmatprep.subr.bf16.mxu1 %v3177_v2 }
 0x187   :  { %2492 = vmatpush3.bf16.msra.mxu1 %v3393_v33 }
 0x188   :  { %2493 = vmatprep.subr.bf16.mxu1 %v3177_v2 }
 0x18b   :  { %2494 = vmatpush3.bf16.msra.mxu1 %v3398_v34 }
 0x18c   :  { %2519 = vmatprep.subr.bf16.mxu1 %v3177_v2 }
 0x20e   :  { %v336_v37 = vpop.f32.mrf.mxu1 }
 0x20f   :  { %v337_v38 = vadd.f32 %v2157_v36, %v336_v37 }
 0x210   :  { %v2425_v40 = vpop.f32.mrf.mxu1 }
 0x211   :  { %v346_v42 = vmul.f32 %v345_v39, %v337_v38  ;;  %vm343_vm6 = vcmp.ge.f32.partialorder %v337_v38, 0.0 }
 0x212   :  { %v339_v41 = vpop.f32.mrf.mxu1 }
 0x213   :  { %v340_v43 = vadd.f32 %v2157_v36, %v339_v41  ;;  %v348_v46 = vsel %vm343_vm6, %v337_v38, %v346_v42 }
 0x214   :  { %v2426_v44 = vpop.f32.mrf.mxu1 }
 0x215   :  { %vm344_vm7 = vcmp.ge.f32.partialorder %v340_v43, 0.0  ;;  %v347_v45 = vmul.f32 %v345_v39, %v340_v43 }
 0x217   :  { %v349_v47 = vsel %vm344_vm7, %v340_v43, %v347_v45 }
 0x218   :  { %v365_v48 = vpack.c.bf16 %v349_v47, %v348_v46 }
 0x21a   :  { %2436 = vmatmul.mubr.msk.bf16.vlgmr.msra.gmra.mxu0 %vm298_vm5, %v365_v48 }
 0x21b   :  { %2460 = vmatpush3.bf16.msra.mxu0 %v3364_v23  ;;  %2475 = vmatprep.mubr.msk.bf16.mxu0 %vm3178_vm1, %v3177_v2 }
 0x21c   :  { %2461 = vmatprep.subr.bf16.mxu0 %v3177_v2 }
 0x21f   :  { %2462 = vmatpush3.bf16.msra.mxu0 %v3368_v25 }
 0x220   :  { %2463 = vmatprep.subr.bf16.mxu0 %v3177_v2 }
 0x223   :  { %2464 = vmatpush3.bf16.msra.mxu0 %v3374_v26 }
 0x224   :  { %2465 = vmatprep.subr.bf16.mxu0 %v3177_v2 }
 0x227   :  { %2466 = vmatpush3.bf16.msra.mxu0 %v3378_v27 }
 0x228   :  { %2467 = vmatprep.subr.bf16.mxu0 %v3177_v2 }
 0x22b   :  { %2468 = vmatpush3.bf16.msra.mxu0 %v3383_v29 }
 0x22c   :  { %2469 = vmatprep.subr.bf16.mxu0 %v3177_v2 }
 0x22e   :  { %v555_v49 = vpop.f32.mrf.mxu1 }
 0x22f   :  { %2470 = vmatpush3.bf16.msra.mxu0 %v3388_v31 }
 0x230   :  { %2471 = vmatprep.subr.bf16.mxu0 %v3177_v2  ;;  %v2457_v50 = vpop.f32.mrf.mxu1 }
 0x232   :  { %v558_v51 = vpop.f32.mrf.mxu1 }
 0x233   :  { %2472 = vmatpush3.bf16.msra.mxu0 %v3393_v33 }
 0x234   :  { %2473 = vmatprep.subr.bf16.mxu0 %v3177_v2  ;;  %v2458_v52 = vpop.f32.mrf.mxu1 }
 0x237   :  { %2474 = vmatpush3.bf16.msra.mxu0 %v3398_v34 }
 0x238   :  { %2499 = vmatprep.subr.bf16.mxu0 %v3177_v2 }
 0x2da   :  { %v434_v55 = vpop.f32.mrf.mxu0 }
 0x2db   :  { %v435_v57 = vadd.f32 %v2163_v54, %v434_v55 }
 0x2dc   :  { %v2437_v58 = vpop.f32.mrf.mxu0 }
 0x2dd   :  { %441 = vst [vmem:[#allocation2] ss:$4 sps:$4 sm:$0xff] %v435_v57  }
 0x2de   :  { %v437_v59 = vpop.f32.mrf.mxu0 }
 0x2df   :  { %v438_v60 = vadd.f32 %v2163_v54, %v437_v59 }
 0x2e0   :  { %v2438_v61 = vpop.f32.mrf.mxu0 }
 0x2e1   :  { %449 = vst [vmem:[#allocation2 + $0x8] ss:$4 sps:$4 sm:$0xff] %v438_v60  }
 0x2e4   :  { %v472_v0 = vld [vmem:[#allocation2] sm:$0x3]  ;;  %v575_v16 = vld [vmem:[#allocation2 + $0x2] sm:$0x3]  ;;  %v631_v43 = vld [vmem:[#allocation2 + $0x4] sm:$0x3] }
 0x2e5   :  { %v561_v1 = vadd.f32 %v555_v49, %v472_v0 }
 0x2e7   :  { %v562_v3 = vmul.f32 %v561_v1, %v3440_v63 }
 0x2e9   :  { %2873 = vtanh.f32 %v562_v3  ;;  %v687_v3 = vld [vmem:[#allocation2 + $0x6] sm:$0x3] }
 0x2f6   :  { %v2874_v4 = vpop.eup %2873 }
 0x2f7   :  { %v564_v6 = vmul.f32 %v2874_v4, %v3440_v63 }
 0x2f9   :  { %v565_v7 = vadd.f32 %v564_v6, %v3443_v5 }
 0x2fb   :  { %566 = vrot.lane.b32.xlu0 %v565_v7, %s3173_s3  ;;  %v571_v10 = vmul.f32 0.0, %v565_v7 }
 0x36d   :  { %v567_v8 = vpop.permute.xlu0 %566 }
 0x36e   :  { %v568_v9 = vmul.f32 %v567_v8, %v565_v7 }
 0x370   :  { %569 = vrot.lane.b32.xlu0 %v568_v9, %s3181_s30 }
 0x3e2   :  { %v570_v11 = vpop.permute.xlu0 %569 }
 0x3e3   :  { %v572_v12 = vadd.f32 %v571_v10, %v570_v11 }
 0x3e5   :  { %2875 = vtanh.f32 %v572_v12 }
 0x3f2   :  { %v2876_v13 = vpop.eup %2875 }
 0x3f3   :  { %v3449_v14 = vmul.f32 %v2876_v13, %v567_v8 }
 0x3f5   :  { %v576_v15 = vpack.c.bf16 %v3449_v14, %v3449_v14 }
 0x3f7   :  { %2476 = vmatmul.mubr.bf16.vlgmr.msra.gmra.mxu0 %v576_v15 }
 0x3f8   :  { %2500 = vmatpush3.bf16.msra.mxu0 %v3364_v23  ;;  %2515 = vmatprep.mubr.msk.bf16.mxu0 %vm3178_vm1, %v3177_v2 }
 0x3f9   :  { %2501 = vmatprep.subr.bf16.mxu0 %v3177_v2 }
 0x3fc   :  { %2502 = vmatpush3.bf16.msra.mxu0 %v3368_v25 }
 0x3fd   :  { %2503 = vmatprep.subr.bf16.mxu0 %v3177_v2 }
 0x400   :  { %2504 = vmatpush3.bf16.msra.mxu0 %v3374_v26 }
 0x401   :  { %2505 = vmatprep.subr.bf16.mxu0 %v3177_v2 }
 0x404   :  { %2506 = vmatpush3.bf16.msra.mxu0 %v3378_v27 }
 0x405   :  { %2507 = vmatprep.subr.bf16.mxu0 %v3177_v2 }
 0x408   :  { %2508 = vmatpush3.bf16.msra.mxu0 %v3383_v29 }
 0x409   :  { %2509 = vmatprep.subr.bf16.mxu0 %v3177_v2 }
 0x40c   :  { %2510 = vmatpush3.bf16.msra.mxu0 %v3388_v31 }
 0x40d   :  { %2511 = vmatprep.subr.bf16.mxu0 %v3177_v2 }
 0x410   :  { %2512 = vmatpush3.bf16.msra.mxu0 %v3393_v33 }
 0x411   :  { %2513 = vmatprep.subr.bf16.mxu0 %v3177_v2 }
 0x414   :  { %2514 = vmatpush3.bf16.msra.mxu0 %v3398_v34 }
 0x415   :  { %2539 = vmatprep.subr.bf16.mxu0 %v3177_v2 }
 0x4b7   :  { %v611_v17 = vpop.f32.mrf.mxu0 }
 0x4b8   :  { %v617_v18 = vadd.f32 %v611_v17, %v575_v16 }
 0x4b9   :  { %v2477_v19 = vpop.f32.mrf.mxu0 }
 0x4ba   :  { %v618_v20 = vmul.f32 %v617_v18, %v3440_v63 }
 0x4bb   :  { %v614_v21 = vpop.f32.mrf.mxu0 }
 0x4bc   :  { %2877 = vtanh.f32 %v618_v20 }
 0x4bd   :  { %v2478_v22 = vpop.f32.mrf.mxu0 }
 0x4c9   :  { %v2878_v24 = vpop.eup %2877 }
 0x4ca   :  { %v620_v28 = vmul.f32 %v2878_v24, %v3440_v63 }
 0x4cc   :  { %v621_v30 = vadd.f32 %v620_v28, %v3443_v5  ;;  %v743_v28 = vld [vmem:[#allocation2 + $0x8] sm:$0x3] }
 0x4ce   :  { %622 = vrot.lane.b32.xlu1 %v621_v30, %s3173_s3  ;;  %v627_v37 = vmul.f32 %v621_v30, %v572_v12 }
 0x540   :  { %v623_v32 = vpop.permute.xlu1 %622 }
 0x541   :  { %v624_v36 = vmul.f32 %v623_v32, %v621_v30 }
 0x543   :  { %625 = vrot.lane.b32.xlu1 %v624_v36, %s3181_s30 }
 0x5b5   :  { %v626_v38 = vpop.permute.xlu1 %625 }
 0x5b6   :  { %v628_v39 = vadd.f32 %v627_v37, %v626_v38 }
 0x5b8   :  { %2879 = vtanh.f32 %v628_v39 }
 0x5c5   :  { %v2880_v40 = vpop.eup %2879 }
 0x5c6   :  { %v630_v41 = vmul.f32 %v2880_v40, %v623_v32 }
 0x5c8   :  { %v632_v42 = vpack.c.bf16 %v630_v41, %v630_v41  ;;  %v968_v59 = vrot.slane %v630_v41, 6 }
 0x5ca   :  { %2496 = vmatmul.mubr.bf16.vlgmr.msra.gmra.mxu1 %v632_v42  ;;  %v985_v0 = vsel %vm206_vm0, %v3449_v14, %v968_v59 }
 0x5cb   :  { %2520 = vmatpush3.bf16.msra.mxu1 %v3364_v23  ;;  %2535 = vmatprep.mubr.msk.bf16.mxu1 %vm3178_vm1, %v3177_v2 }
 0x5cc   :  { %2521 = vmatprep.subr.bf16.mxu1 %v3177_v2 }
 0x5cf   :  { %2522 = vmatpush3.bf16.msra.mxu1 %v3368_v25 }
 0x5d0   :  { %2523 = vmatprep.subr.bf16.mxu1 %v3177_v2 }
 0x5d3   :  { %2524 = vmatpush3.bf16.msra.mxu1 %v3374_v26 }
 0x5d4   :  { %2525 = vmatprep.subr.bf16.mxu1 %v3177_v2 }
 0x5d7   :  { %2526 = vmatpush3.bf16.msra.mxu1 %v3378_v27 }
 0x5d8   :  { %2527 = vmatprep.subr.bf16.mxu1 %v3177_v2 }
 0x5db   :  { %2528 = vmatpush3.bf16.msra.mxu1 %v3383_v29 }
 0x5dc   :  { %2529 = vmatprep.subr.bf16.mxu1 %v3177_v2 }
 0x5df   :  { %2530 = vmatpush3.bf16.msra.mxu1 %v3388_v31 }
 0x5e0   :  { %2531 = vmatprep.subr.bf16.mxu1 %v3177_v2 }
 0x5e3   :  { %2532 = vmatpush3.bf16.msra.mxu1 %v3393_v33 }
 0x5e4   :  { %2533 = vmatprep.subr.bf16.mxu1 %v3177_v2 }
 0x5e7   :  { %2534 = vmatpush3.bf16.msra.mxu1 %v3398_v34 }
 0x5e8   :  { %2559 = vmatprep.subr.bf16.mxu1 %v3177_v2 }
 0x68a   :  { %v667_v44 = vpop.f32.mrf.mxu1 }
 0x68b   :  { %v673_v45 = vadd.f32 %v667_v44, %v631_v43 }
 0x68c   :  { %v2497_v46 = vpop.f32.mrf.mxu1 }
 0x68d   :  { %v674_v47 = vmul.f32 %v673_v45, %v3440_v63 }
 0x68e   :  { %v670_v48 = vpop.f32.mrf.mxu1 }
 0x68f   :  { %2881 = vtanh.f32 %v674_v47 }
 0x690   :  { %v2498_v49 = vpop.f32.mrf.mxu1 }
 0x69c   :  { %v2882_v50 = vpop.eup %2881 }
 0x69d   :  { %v676_v51 = vmul.f32 %v2882_v50, %v3440_v63 }
 0x69f   :  { %v677_v52 = vadd.f32 %v676_v51, %v3443_v5 }
 0x6a1   :  { %678 = vrot.lane.b32.xlu0 %v677_v52, %s3173_s3  ;;  %v683_v55 = vmul.f32 %v677_v52, %v628_v39 }
 0x713   :  { %v679_v53 = vpop.permute.xlu0 %678 }
 0x714   :  { %v680_v54 = vmul.f32 %v679_v53, %v677_v52 }
 0x716   :  { %681 = vrot.lane.b32.xlu1 %v680_v54, %s3181_s30 }
 0x788   :  { %v682_v56 = vpop.permute.xlu1 %681 }
 0x789   :  { %v684_v57 = vadd.f32 %v683_v55, %v682_v56 }
 0x78b   :  { %2883 = vtanh.f32 %v684_v57 }
 0x798   :  { %v2884_v58 = vpop.eup %2883 }
 0x799   :  { %v686_v60 = vmul.f32 %v2884_v58, %v679_v53 }
 0x79b   :  { %v688_v61 = vpack.c.bf16 %v686_v60, %v686_v60  ;;  %v971_v62 = vrot.slane %v686_v60, 4 }
 0x79d   :  { %2516 = vmatmul.mubr.bf16.vlgmr.msra.gmra.mxu0 %v688_v61  ;;  %v987_v1 = vsel %vm986_vm11, %v985_v0, %v971_v62  ;;  %v855_v61 = vld [vmem:[#allocation2 + $0xc] sm:$0x3] }
 0x79e   :  { %2540 = vmatpush3.bf16.msra.mxu0 %v3364_v23  ;;  %2555 = vmatprep.mubr.msk.bf16.mxu0 %vm3178_vm1, %v3177_v2 }
 0x79f   :  { %2541 = vmatprep.subr.bf16.mxu0 %v3177_v2 }
 0x7a2   :  { %2542 = vmatpush3.bf16.msra.mxu0 %v3368_v25 }
 0x7a3   :  { %2543 = vmatprep.subr.bf16.mxu0 %v3177_v2 }
 0x7a6   :  { %2544 = vmatpush3.bf16.msra.mxu0 %v3374_v26 }
 0x7a7   :  { %2545 = vmatprep.subr.bf16.mxu0 %v3177_v2 }
 0x7aa   :  { %2546 = vmatpush3.bf16.msra.mxu0 %v3378_v27 }
 0x7ab   :  { %2547 = vmatprep.subr.bf16.mxu0 %v3177_v2 }
 0x7ae   :  { %2548 = vmatpush3.bf16.msra.mxu0 %v3383_v29 }
 0x7af   :  { %2549 = vmatprep.subr.bf16.mxu0 %v3177_v2 }
 0x7b2   :  { %2550 = vmatpush3.bf16.msra.mxu0 %v3388_v31 }
 0x7b3   :  { %2551 = vmatprep.subr.bf16.mxu0 %v3177_v2 }
 0x7b6   :  { %2552 = vmatpush3.bf16.msra.mxu0 %v3393_v33 }
 0x7b7   :  { %2553 = vmatprep.subr.bf16.mxu0 %v3177_v2 }
 0x7ba   :  { %2554 = vmatpush3.bf16.msra.mxu0 %v3398_v34 }
 0x7bb   :  { %2579 = vmatprep.subr.bf16.mxu0 %v3177_v2 }
 0x85d   :  { %v723_v4 = vpop.f32.mrf.mxu0 }
 0x85e   :  { %v729_v6 = vadd.f32 %v723_v4, %v687_v3 }
 0x85f   :  { %v2517_v7 = vpop.f32.mrf.mxu0 }
 0x860   :  { %v730_v8 = vmul.f32 %v729_v6, %v3440_v63 }
 0x861   :  { %v726_v9 = vpop.f32.mrf.mxu0 }
 0x862   :  { %2885 = vtanh.f32 %v730_v8 }
 0x863   :  { %v2518_v10 = vpop.f32.mrf.mxu0 }
 0x86f   :  { %v2886_v11 = vpop.eup %2885 }
 0x870   :  { %v732_v12 = vmul.f32 %v2886_v11, %v3440_v63 }
 0x872   :  { %v733_v13 = vadd.f32 %v732_v12, %v3443_v5 }
 0x874   :  { %734 = vrot.lane.b32.xlu0 %v733_v13, %s3173_s3  ;;  %v739_v16 = vmul.f32 %v733_v13, %v684_v57 }
 0x8e6   :  { %v735_v14 = vpop.permute.xlu0 %734 }
 0x8e7   :  { %v736_v15 = vmul.f32 %v735_v14, %v733_v13 }
 0x8e9   :  { %737 = vrot.lane.b32.xlu1 %v736_v15, %s3181_s30 }
 0x95b   :  { %v738_v17 = vpop.permute.xlu1 %737 }
 0x95c   :  { %v740_v18 = vadd.f32 %v739_v16, %v738_v17 }
 0x95e   :  { %2887 = vtanh.f32 %v740_v18 }
 0x96b   :  { %v2888_v19 = vpop.eup %2887 }
 0x96c   :  { %v742_v20 = vmul.f32 %v2888_v19, %v735_v14 }
 0x96e   :  { %v744_v21 = vpack.c.bf16 %v742_v20, %v742_v20  ;;  %v974_v22 = vrot.slane %v742_v20, 2 }
 0x970   :  { %2536 = vmatmul.mubr.bf16.vlgmr.msra.gmra.mxu1 %v744_v21  ;;  %v3526_v24 = vsel %vm988_vm12, %v987_v1, %v974_v22  ;;  %v911_v22 = vld [vmem:[#allocation2 + $0xe] sm:$0x3] }
 0x971   :  { %2560 = vmatpush3.bf16.msra.mxu1 %v3364_v23  ;;  %2575 = vmatprep.mubr.msk.bf16.mxu1 %vm3178_vm1, %v3177_v2 }
 0x972   :  { %2561 = vmatprep.subr.bf16.mxu1 %v3177_v2 }
 0x975   :  { %2562 = vmatpush3.bf16.msra.mxu1 %v3368_v25 }
 0x976   :  { %2563 = vmatprep.subr.bf16.mxu1 %v3177_v2 }
 0x979   :  { %2564 = vmatpush3.bf16.msra.mxu1 %v3374_v26 }
 0x97a   :  { %2565 = vmatprep.subr.bf16.mxu1 %v3177_v2 }
 0x97d   :  { %2566 = vmatpush3.bf16.msra.mxu1 %v3378_v27 }
 0x97e   :  { %2567 = vmatprep.subr.bf16.mxu1 %v3177_v2 }
 0x981   :  { %2568 = vmatpush3.bf16.msra.mxu1 %v3383_v29 }
 0x982   :  { %2569 = vmatprep.subr.bf16.mxu1 %v3177_v2 }
 0x985   :  { %2570 = vmatpush3.bf16.msra.mxu1 %v3388_v31 }
 0x986   :  { %2571 = vmatprep.subr.bf16.mxu1 %v3177_v2 }
 0x989   :  { %2572 = vmatpush3.bf16.msra.mxu1 %v3393_v33 }
 0x98a   :  { %2573 = vmatprep.subr.bf16.mxu1 %v3177_v2 }
 0x98d   :  { %2574 = vmatpush3.bf16.msra.mxu1 %v3398_v34 }
 0x98e   :  { %2599 = vmatprep.subr.bf16.mxu1 %v3177_v2 }
 0xa30   :  { %v779_v30 = vpop.f32.mrf.mxu1 }
 0xa31   :  { %v785_v32 = vadd.f32 %v779_v30, %v743_v28 }
 0xa32   :  { %v2537_v36 = vpop.f32.mrf.mxu1 }
 0xa33   :  { %v786_v37 = vmul.f32 %v785_v32, %v3440_v63 }
 0xa34   :  { %v782_v38 = vpop.f32.mrf.mxu1 }
 0xa35   :  { %2889 = vtanh.f32 %v786_v37 }
 0xa36   :  { %v2538_v39 = vpop.f32.mrf.mxu1 }
 0xa37   :  { %v2844_v39 = vld [vmem:[%s3944_s9 + $0x78] sm:$0xff]  }
 0xa42   :  { %v2890_v40 = vpop.eup %2889 }
 0xa43   :  { %v788_v41 = vmul.f32 %v2890_v40, %v3440_v63  ;;  %v3599_v40 = vld [vmem:[#allocation16 + $0x78] sm:$0xff]  }
 0xa45   :  { %v789_v42 = vadd.f32 %v788_v41, %v3443_v5  ;;  %v2845_v41 = vld [vmem:[%s3944_s9 + $0x70] sm:$0xff]  }
 0xa47   :  { %790 = vrot.lane.b32.xlu0 %v789_v42, %s3173_s3  ;;  %v795_v45 = vmul.f32 %v789_v42, %v740_v18 }
 0xab9   :  { %v791_v43 = vpop.permute.xlu0 %790 }
 0xaba   :  { %v792_v44 = vmul.f32 %v791_v43, %v789_v42 }
 0xabc   :  { %793 = vrot.lane.b32.xlu1 %v792_v44, %s3181_s30 }
 0xb2e   :  { %v794_v46 = vpop.permute.xlu1 %793 }
 0xb2f   :  { %v796_v47 = vadd.f32 %v795_v45, %v794_v46  ;;  %v2847_v45 = vld [vmem:[%s3944_s9 + $0x68] sm:$0xff]  }
 0xb30   :  { %v3614_v46 = vld [vmem:[#allocation16 + $0x70] sm:$0xff]  }
 0xb31   :  { %2891 = vtanh.f32 %v796_v47 }
 0xb3e   :  { %v2892_v48 = vpop.eup %2891 }
 0xb3f   :  { %v3551_v49 = vmul.f32 %v2892_v48, %v791_v43  ;;  %v3622_v48 = vld [vmem:[#allocation16 + $0x68] sm:$0xff]  }
 0xb41   :  { %v800_v50 = vpack.c.bf16 %v3551_v49, %v3551_v49 }
 0xb43   :  { %2556 = vmatmul.mubr.bf16.vlgmr.msra.gmra.mxu0 %v800_v50  ;;  %v3628_v50 = vld [vmem:[#allocation16 + $0x60] sm:$0xff]  }
 0xb44   :  { %2580 = vmatpush3.bf16.msra.mxu0 %v3364_v23  ;;  %2595 = vmatprep.mubr.msk.bf16.mxu0 %vm3178_vm1, %v3177_v2  ;;  %v799_v23 = vld [vmem:[#allocation2 + $0xa] sm:$0x3] }
 0xb45   :  { %2581 = vmatprep.subr.bf16.mxu0 %v3177_v2 }
 0xb48   :  { %2582 = vmatpush3.bf16.msra.mxu0 %v3368_v25 }
 0xb49   :  { %2583 = vmatprep.subr.bf16.mxu0 %v3177_v2 }
 0xb4c   :  { %2584 = vmatpush3.bf16.msra.mxu0 %v3374_v26 }
 0xb4d   :  { %2585 = vmatprep.subr.bf16.mxu0 %v3177_v2 }
 0xb50   :  { %2586 = vmatpush3.bf16.msra.mxu0 %v3378_v27 }
 0xb51   :  { %2587 = vmatprep.subr.bf16.mxu0 %v3177_v2 }
 0xb54   :  { %2588 = vmatpush3.bf16.msra.mxu0 %v3383_v29 }
 0xb55   :  { %2589 = vmatprep.subr.bf16.mxu0 %v3177_v2 }
 0xb58   :  { %2590 = vmatpush3.bf16.msra.mxu0 %v3388_v31 }
 0xb59   :  { %2591 = vmatprep.subr.bf16.mxu0 %v3177_v2 }
 0xb5c   :  { %2592 = vmatpush3.bf16.msra.mxu0 %v3393_v33 }
 0xb5d   :  { %2593 = vmatprep.subr.bf16.mxu0 %v3177_v2 }
 0xb60   :  { %2594 = vmatpush3.bf16.msra.mxu0 %v3398_v34 }
 0xb61   :  { %2619 = vmatprep.subr.bf16.mxu0 %v3177_v2 }
 0xc03   :  { %v835_v25 = vpop.f32.mrf.mxu0 }
 0xc04   :  { %v841_v26 = vadd.f32 %v835_v25, %v799_v23  ;;  %v2853_v23 = vld [vmem:[%s3944_s9 + $0x50] sm:$0xff]  }
 0xc05   :  { %v2557_v27 = vpop.f32.mrf.mxu0 }
 0xc06   :  { %v842_v29 = vmul.f32 %v841_v26, %v3440_v63  ;;  %v3638_v26 = vld [vmem:[#allocation16 + $0x58] sm:$0xff]  }
 0xc07   :  { %v838_v51 = vpop.f32.mrf.mxu0 }
 0xc08   :  { %2893 = vtanh.f32 %v842_v29  ;;  %v2855_v29 = vld [vmem:[%s3944_s9 + $0x48] sm:$0xff]  }
 0xc09   :  { %v2558_v52 = vpop.f32.mrf.mxu0  ;;  %v3646_v51 = vld [vmem:[#allocation16 + $0x50] sm:$0xff]  }
 0xc0a   :  { %v2857_v52 = vld [vmem:[%s3944_s9 + $0x40] sm:$0xff]  }
 0xc15   :  { %v2894_v31 = vpop.eup %2893 }
 0xc16   :  { %v844_v53 = vmul.f32 %v2894_v31, %v3440_v63  ;;  %v3654_v31 = vld [vmem:[#allocation16 + $0x48] sm:$0xff]  }
 0xc18   :  { %v845_v33 = vadd.f32 %v844_v53, %v3443_v5  ;;  %v3660_v53 = vld [vmem:[#allocation16 + $0x40] sm:$0xff]  }
 0xc1a   :  { %846 = vrot.lane.b32.xlu0 %v845_v33, %s3173_s3  ;;  %v851_v55 = vmul.f32 %v845_v33, %v796_v47  ;;  %v2849_v47 = vld [vmem:[%s3944_s9 + $0x60] sm:$0xff]  }
 0xc8c   :  { %v847_v54 = vpop.permute.xlu0 %846 }
 0xc8d   :  { %v848_v34 = vmul.f32 %v847_v54, %v845_v33 }
 0xc8f   :  { %849 = vrot.lane.b32.xlu1 %v848_v34, %s3181_s30 }
 0xd01   :  { %v850_v56 = vpop.permute.xlu1 %849 }
 0xd02   :  { %v852_v57 = vadd.f32 %v851_v55, %v850_v56 }
 0xd04   :  { %2895 = vtanh.f32 %v852_v57 }
 0xd11   :  { %v2896_v58 = vpop.eup %2895 }
 0xd12   :  { %v854_v59 = vmul.f32 %v2896_v58, %v847_v54 }
 0xd14   :  { %v856_v60 = vpack.c.bf16 %v854_v59, %v854_v59  ;;  %v977_v16 = vrot.slane %v854_v59, 6 }
 0xd16   :  { %2576 = vmatmul.mubr.bf16.vlgmr.msra.gmra.mxu1 %v856_v60  ;;  %v990_v20 = vsel %vm206_vm0, %v3551_v49, %v977_v16  ;;  %v2851_v49 = vld [vmem:[%s3944_s9 + $0x58] sm:$0xff]  }
 0xd17   :  { %2615 = vmatprep.mubr.msk.bf16.mxu1 %vm3178_vm1, %v3177_v2  ;;  %2600 = vmatpush3.bf16.msra.mxu1 %v2844_v39 }
 0xd18   :  { %2601 = vmatprep.subr.bf16.mxu1 %v3177_v2 }
 0xd1b   :  { %2602 = vmatpush3.bf16.msra.mxu1 %v2845_v41 }
 0xd1c   :  { %2603 = vmatprep.subr.bf16.mxu1 %v3177_v2 }
 0xd1f   :  { %2604 = vmatpush3.bf16.msra.mxu1 %v2847_v45 }
 0xd20   :  { %2605 = vmatprep.subr.bf16.mxu1 %v3177_v2 }
 0xd23   :  { %2606 = vmatpush3.bf16.msra.mxu1 %v2849_v47 }
 0xd24   :  { %2607 = vmatprep.subr.bf16.mxu1 %v3177_v2 }
 0xd27   :  { %2608 = vmatpush3.bf16.msra.mxu1 %v2851_v49 }
 0xd28   :  { %2609 = vmatprep.subr.bf16.mxu1 %v3177_v2 }
 0xd2b   :  { %2610 = vmatpush3.bf16.msra.mxu1 %v2853_v23 }
 0xd2c   :  { %2611 = vmatprep.subr.bf16.mxu1 %v3177_v2 }
 0xd2f   :  { %2612 = vmatpush3.bf16.msra.mxu1 %v2855_v29 }
 0xd30   :  { %2613 = vmatprep.subr.bf16.mxu1 %v3177_v2 }
 0xd33   :  { %2614 = vmatpush3.bf16.msra.mxu1 %v2857_v52 }
 0xd34   :  { %2639 = vmatprep.subr.bf16.mxu1 %v3177_v2 }
 0xdd6   :  { %v891_v62 = vpop.f32.mrf.mxu1 }
 0xdd7   :  { %v897_v0 = vadd.f32 %v891_v62, %v855_v61 }
 0xdd8   :  { %v2577_v1 = vpop.f32.mrf.mxu1 }
 0xdd9   :  { %v898_v3 = vmul.f32 %v897_v0, %v3440_v63  ;;  %v2193_v0 = vld [vmem:[#allocation17 + $0x1] ss:$0 sm:$0xff] }
 0xdda   :  { %v894_v4 = vpop.f32.mrf.mxu1 }
 0xddb   :  { %2897 = vtanh.f32 %v898_v3 }
 0xddc   :  { %v2578_v6 = vpop.f32.mrf.mxu1 }
 0xde8   :  { %v2898_v7 = vpop.eup %2897 }
 0xde9   :  { %v900_v8 = vmul.f32 %v2898_v7, %v3440_v63 }
 0xdeb   :  { %v901_v9 = vadd.f32 %v900_v8, %v3443_v5 }
 0xded   :  { %902 = vrot.lane.b32.xlu0 %v901_v9, %s3173_s3  ;;  %v907_v12 = vmul.f32 %v901_v9, %v852_v57 }
 0xe5f   :  { %v903_v10 = vpop.permute.xlu0 %902 }
 0xe60   :  { %v904_v11 = vmul.f32 %v903_v10, %v901_v9 }
 0xe62   :  { %905 = vrot.lane.b32.xlu1 %v904_v11, %s3181_s30 }
 0xed4   :  { %v906_v13 = vpop.permute.xlu1 %905 }
 0xed5   :  { %v3585_v14 = vadd.f32 %v907_v12, %v906_v13 }
 0xed7   :  { %2899 = vtanh.f32 %v3585_v14 }
 0xee4   :  { %v2900_v15 = vpop.eup %2899 }
 0xee5   :  { %v910_v17 = vmul.f32 %v2900_v15, %v903_v10 }
 0xee7   :  { %v912_v18 = vpack.c.bf16 %v910_v17, %v910_v17  ;;  %v980_v19 = vrot.slane %v910_v17, 4 }
 0xee9   :  { %2596 = vmatmul.mubr.bf16.vlgmr.msra.gmra.mxu0 %v912_v18  ;;  %v3591_v21 = vsel %vm986_vm11, %v990_v20, %v980_v19 }
 0xeea   :  { %2635 = vmatprep.mubr.msk.bf16.mxu0 %vm3178_vm1, %v3177_v2  ;;  %2620 = vmatpush3.bf16.msra.mxu0 %v3599_v40 }
 0xeeb   :  { %2621 = vmatprep.subr.bf16.mxu0 %v3177_v2 }
 0xeee   :  { %2622 = vmatpush3.bf16.msra.mxu0 %v3614_v46 }
 0xeef   :  { %2623 = vmatprep.subr.bf16.mxu0 %v3177_v2 }
 0xef2   :  { %2624 = vmatpush3.bf16.msra.mxu0 %v3622_v48 }
 0xef3   :  { %2625 = vmatprep.subr.bf16.mxu0 %v3177_v2 }
 0xef6   :  { %2626 = vmatpush3.bf16.msra.mxu0 %v3628_v50 }
 0xef7   :  { %2627 = vmatprep.subr.bf16.mxu0 %v3177_v2 }
 0xefa   :  { %2628 = vmatpush3.bf16.msra.mxu0 %v3638_v26 }
 0xefb   :  { %2629 = vmatprep.subr.bf16.mxu0 %v3177_v2 }
 0xefe   :  { %2630 = vmatpush3.bf16.msra.mxu0 %v3646_v51 }
 0xeff   :  { %2631 = vmatprep.subr.bf16.mxu0 %v3177_v2 }
 0xf02   :  { %2632 = vmatpush3.bf16.msra.mxu0 %v3654_v31 }
 0xf03   :  { %2633 = vmatprep.subr.bf16.mxu0 %v3177_v2 }
 0xf06   :  { %2634 = vmatpush3.bf16.msra.mxu0 %v3660_v53 }
 0xf07   :  { %2659 = vmatprep.subr.bf16.mxu0 %v3177_v2 }
 0xf09   :  { %2636 = vmatmul.mubr.bf16.vlgmr.msra.gmra.mxu0 %v3179_v35 }
 0xf0a   :  { %2660 = vmatpush3.bf16.msra.mxu0 %v3599_v40  ;;  %2675 = vmatprep.mubr.msk.bf16.mxu0 %vm3178_vm1, %v3177_v2 }
 0xf0b   :  { %2661 = vmatprep.subr.bf16.mxu0 %v3177_v2 }
 0xf0e   :  { %2662 = vmatpush3.bf16.msra.mxu0 %v3614_v46 }
 0xf0f   :  { %2663 = vmatprep.subr.bf16.mxu0 %v3177_v2 }
 0xf12   :  { %2664 = vmatpush3.bf16.msra.mxu0 %v3622_v48 }
 0xf13   :  { %2665 = vmatprep.subr.bf16.mxu0 %v3177_v2 }
 0xf16   :  { %2666 = vmatpush3.bf16.msra.mxu0 %v3628_v50 }
 0xf17   :  { %2667 = vmatprep.subr.bf16.mxu0 %v3177_v2 }
 0xf1a   :  { %2668 = vmatpush3.bf16.msra.mxu0 %v3638_v26 }
 0xf1b   :  { %2669 = vmatprep.subr.bf16.mxu0 %v3177_v2 }
 0xf1e   :  { %2670 = vmatpush3.bf16.msra.mxu0 %v3646_v51 }
 0xf1f   :  { %2671 = vmatprep.subr.bf16.mxu0 %v3177_v2 }
 0xf22   :  { %2672 = vmatpush3.bf16.msra.mxu0 %v3654_v31 }
 0xf23   :  { %2673 = vmatprep.subr.bf16.mxu0 %v3177_v2 }
 0xf26   :  { %2674 = vmatpush3.bf16.msra.mxu0 %v3660_v53 }
 0xf27   :  { %2699 = vmatprep.subr.bf16.mxu0 %v3177_v2 }
 0xfa9   :  { %v947_v28 = vpop.f32.mrf.mxu0 }
 0xfaa   :  { %v953_v30 = vadd.f32 %v947_v28, %v911_v22 }
 0xfab   :  { %v2597_v32 = vpop.f32.mrf.mxu0 }
 0xfac   :  { %v954_v36 = vmul.f32 %v953_v30, %v3440_v63 }
 0xfad   :  { %v950_v37 = vpop.f32.mrf.mxu0 }
 0xfae   :  { %2901 = vtanh.f32 %v954_v36 }
 0xfaf   :  { %v2598_v38 = vpop.f32.mrf.mxu0 }
 0xfbb   :  { %v2902_v42 = vpop.eup %2901 }
 0xfbc   :  { %v956_v43 = vmul.f32 %v2902_v42, %v3440_v63 }
 0xfbe   :  { %v957_v44 = vadd.f32 %v956_v43, %v3443_v5 }
 0xfc0   :  { %958 = vrot.lane.b32.xlu0 %v957_v44, %s3173_s3  ;;  %v963_v33 = vmul.f32 %v957_v44, %v3585_v14 }
0x1032   :  { %v959_v25 = vpop.permute.xlu0 %958 }
0x1033   :  { %v960_v27 = vmul.f32 %v959_v25, %v957_v44 }
0x1035   :  { %961 = vrot.lane.b32.xlu1 %v960_v27, %s3181_s30 }
0x10a7   :  { %v962_v54 = vpop.permute.xlu1 %961 }
0x10a8   :  { %v964_v34 = vadd.f32 %v963_v33, %v962_v54 }
0x10aa   :  { %2903 = vtanh.f32 %v964_v34 }
0x10b7   :  { %v2904_v55 = vpop.eup %2903 }
0x10b8   :  { %v966_v56 = vmul.f32 %v2904_v55, %v959_v25 }
0x10ba   :  { %v983_v57 = vrot.slane %v966_v56, 2 }
0x10bc   :  { %v992_v58 = vsel %vm988_vm12, %v3591_v21, %v983_v57 }
0x10bd   :  { %v1010_v59 = vpack.c.bf16 %v992_v58, %v3526_v24  ;;  %v1216_v24 = vpop.f32.mrf.mxu0 }
0x10bf   :  { %2616 = vmatmul.mubr.bf16.vlgmr.msra.gmra.mxu1 %v1010_v59  ;;  %v2637_v60 = vpop.f32.mrf.mxu0 }
0x10c0   :  { %2640 = vmatpush3.bf16.msra.mxu1 %v3599_v40  ;;  %2655 = vmatprep.mubr.msk.bf16.mxu1 %vm3178_vm1, %v3177_v2 }
0x10c1   :  { %2641 = vmatprep.subr.bf16.mxu1 %v3177_v2  ;;  %v1219_v61 = vpop.f32.mrf.mxu0 }
0x10c3   :  { %v2638_v62 = vpop.f32.mrf.mxu0 }
0x10c4   :  { %2642 = vmatpush3.bf16.msra.mxu1 %v3614_v46 }
0x10c5   :  { %2643 = vmatprep.subr.bf16.mxu1 %v3177_v2 }
0x10c8   :  { %2644 = vmatpush3.bf16.msra.mxu1 %v3622_v48 }
0x10c9   :  { %2645 = vmatprep.subr.bf16.mxu1 %v3177_v2 }
0x10cc   :  { %2646 = vmatpush3.bf16.msra.mxu1 %v3628_v50 }
0x10cd   :  { %2647 = vmatprep.subr.bf16.mxu1 %v3177_v2 }
0x10d0   :  { %2648 = vmatpush3.bf16.msra.mxu1 %v3638_v26 }
0x10d1   :  { %2649 = vmatprep.subr.bf16.mxu1 %v3177_v2 }
0x10d4   :  { %2650 = vmatpush3.bf16.msra.mxu1 %v3646_v51 }
0x10d5   :  { %2651 = vmatprep.subr.bf16.mxu1 %v3177_v2 }
0x10d8   :  { %2652 = vmatpush3.bf16.msra.mxu1 %v3654_v31 }
0x10d9   :  { %2653 = vmatprep.subr.bf16.mxu1 %v3177_v2 }
0x10dc   :  { %2654 = vmatpush3.bf16.msra.mxu1 %v3660_v53 }
0x10dd   :  { %2679 = vmatprep.subr.bf16.mxu1 %v3177_v2 }
0x117f   :  { %v1101_v1 = vpop.f32.mrf.mxu1 }
0x1180   :  { %v1102_v3 = vadd.f32 %v2193_v0, %v1101_v1 }
0x1181   :  { %v2617_v4 = vpop.f32.mrf.mxu1 }
0x1182   :  { %1108 = vst [vmem:[#allocation2] ss:$4 sps:$4 sm:$0xff] %v1102_v3  }
0x1183   :  { %v1104_v6 = vpop.f32.mrf.mxu1 }
0x1184   :  { %v1105_v7 = vadd.f32 %v2193_v0, %v1104_v6 }
0x1185   :  { %v2618_v8 = vpop.f32.mrf.mxu1 }
0x1186   :  { %1112 = vst [vmem:[#allocation2 + $0x8] ss:$4 sps:$4 sm:$0xff] %v1105_v7  }
0x1189   :  { %v1133_v9 = vld [vmem:[#allocation2] sm:$0x3]  ;;  %v1236_v28 = vld [vmem:[#allocation2 + $0x2] sm:$0x3]  ;;  %v1292_v52 = vld [vmem:[#allocation2 + $0x4] sm:$0x3] }
0x118a   :  { %v1222_v10 = vadd.f32 %v1216_v24, %v1133_v9  ;;  %v1348_v7 = vld [vmem:[#allocation2 + $0x6] sm:$0x3] }
0x118c   :  { %v1223_v11 = vmul.f32 %v1222_v10, %v3440_v63 }
0x118e   :  { %2905 = vtanh.f32 %v1223_v11 }
0x119b   :  { %v2906_v12 = vpop.eup %2905 }
0x119c   :  { %v1225_v13 = vmul.f32 %v2906_v12, %v3440_v63 }
0x119e   :  { %v1226_v14 = vadd.f32 %v1225_v13, %v3443_v5 }
0x11a0   :  { %1227 = vrot.lane.b32.xlu0 %v1226_v14, %s3173_s3  ;;  %v1232_v17 = vmul.f32 0.0, %v1226_v14 }
0x1212   :  { %v1228_v15 = vpop.permute.xlu0 %1227 }
0x1213   :  { %v1229_v16 = vmul.f32 %v1228_v15, %v1226_v14 }
0x1215   :  { %1230 = vrot.lane.b32.xlu1 %v1229_v16, %s3181_s30 }
0x1287   :  { %v1231_v18 = vpop.permute.xlu1 %1230 }
0x1288   :  { %v1233_v19 = vadd.f32 %v1232_v17, %v1231_v18 }
0x128a   :  { %2907 = vtanh.f32 %v1233_v19 }
0x1297   :  { %v2908_v20 = vpop.eup %2907 }
0x1298   :  { %v1235_v21 = vmul.f32 %v2908_v20, %v1228_v15 }
0x129a   :  { %v1237_v22 = vpack.c.bf16 %v1235_v21, %v1235_v21 }
0x129c   :  { %2656 = vmatmul.mubr.bf16.vlgmr.msra.gmra.mxu1 %v1237_v22 }
0x129d   :  { %2680 = vmatpush3.bf16.msra.mxu1 %v3599_v40  ;;  %2695 = vmatprep.mubr.msk.bf16.mxu1 %vm3178_vm1, %v3177_v2 }
0x129e   :  { %2681 = vmatprep.subr.bf16.mxu1 %v3177_v2 }
0x12a1   :  { %2682 = vmatpush3.bf16.msra.mxu1 %v3614_v46 }
0x12a2   :  { %2683 = vmatprep.subr.bf16.mxu1 %v3177_v2 }
0x12a5   :  { %2684 = vmatpush3.bf16.msra.mxu1 %v3622_v48 }
0x12a6   :  { %2685 = vmatprep.subr.bf16.mxu1 %v3177_v2 }
0x12a9   :  { %2686 = vmatpush3.bf16.msra.mxu1 %v3628_v50 }
0x12aa   :  { %2687 = vmatprep.subr.bf16.mxu1 %v3177_v2 }
0x12ad   :  { %2688 = vmatpush3.bf16.msra.mxu1 %v3638_v26 }
0x12ae   :  { %2689 = vmatprep.subr.bf16.mxu1 %v3177_v2 }
0x12b1   :  { %2690 = vmatpush3.bf16.msra.mxu1 %v3646_v51 }
0x12b2   :  { %2691 = vmatprep.subr.bf16.mxu1 %v3177_v2 }
0x12b5   :  { %2692 = vmatpush3.bf16.msra.mxu1 %v3654_v31 }
0x12b6   :  { %2693 = vmatprep.subr.bf16.mxu1 %v3177_v2 }
0x12b9   :  { %2694 = vmatpush3.bf16.msra.mxu1 %v3660_v53 }
0x12ba   :  { %2719 = vmatprep.subr.bf16.mxu1 %v3177_v2 }
0x135c   :  { %v1272_v30 = vpop.f32.mrf.mxu1 }
0x135d   :  { %v1278_v32 = vadd.f32 %v1272_v30, %v1236_v28 }
0x135e   :  { %v2657_v36 = vpop.f32.mrf.mxu1 }
0x135f   :  { %v1279_v37 = vmul.f32 %v1278_v32, %v3440_v63  ;;  %v1404_v32 = vld [vmem:[#allocation2 + $0x8] sm:$0x3] }
0x1360   :  { %v1275_v38 = vpop.f32.mrf.mxu1 }
0x1361   :  { %2909 = vtanh.f32 %v1279_v37 }
0x1362   :  { %v2658_v39 = vpop.f32.mrf.mxu1 }
0x136e   :  { %v2910_v41 = vpop.eup %2909 }
0x136f   :  { %v1281_v42 = vmul.f32 %v2910_v41, %v3440_v63 }
0x1371   :  { %v1282_v43 = vadd.f32 %v1281_v42, %v3443_v5 }
0x1373   :  { %1283 = vrot.lane.b32.xlu0 %v1282_v43, %s3173_s3  ;;  %v1288_v47 = vmul.f32 %v1282_v43, %v1233_v19 }
0x13e5   :  { %v1284_v44 = vpop.permute.xlu0 %1283 }
0x13e6   :  { %v1285_v45 = vmul.f32 %v1284_v44, %v1282_v43 }
0x13e8   :  { %1286 = vrot.lane.b32.xlu1 %v1285_v45, %s3181_s30 }
0x145a   :  { %v1287_v49 = vpop.permute.xlu1 %1286 }
0x145b   :  { %v1289_v23 = vadd.f32 %v1288_v47, %v1287_v49 }
0x145d   :  { %2911 = vtanh.f32 %v1289_v23 }
0x146a   :  { %v2912_v25 = vpop.eup %2911 }
0x146b   :  { %v1291_v27 = vmul.f32 %v2912_v25, %v1284_v44 }
0x146d   :  { %v1293_v29 = vpack.c.bf16 %v1291_v27, %v1291_v27 }
0x146f   :  { %2676 = vmatmul.mubr.bf16.vlgmr.msra.gmra.mxu0 %v1293_v29 }
0x1470   :  { %2700 = vmatpush3.bf16.msra.mxu0 %v3599_v40  ;;  %2715 = vmatprep.mubr.msk.bf16.mxu0 %vm3178_vm1, %v3177_v2 }
0x1471   :  { %2701 = vmatprep.subr.bf16.mxu0 %v3177_v2 }
0x1474   :  { %2702 = vmatpush3.bf16.msra.mxu0 %v3614_v46 }
0x1475   :  { %2703 = vmatprep.subr.bf16.mxu0 %v3177_v2 }
0x1478   :  { %2704 = vmatpush3.bf16.msra.mxu0 %v3622_v48 }
0x1479   :  { %2705 = vmatprep.subr.bf16.mxu0 %v3177_v2 }
0x147c   :  { %2706 = vmatpush3.bf16.msra.mxu0 %v3628_v50 }
0x147d   :  { %2707 = vmatprep.subr.bf16.mxu0 %v3177_v2 }
0x1480   :  { %2708 = vmatpush3.bf16.msra.mxu0 %v3638_v26 }
0x1481   :  { %2709 = vmatprep.subr.bf16.mxu0 %v3177_v2 }
0x1484   :  { %2710 = vmatpush3.bf16.msra.mxu0 %v3646_v51 }
0x1485   :  { %2711 = vmatprep.subr.bf16.mxu0 %v3177_v2 }
0x1488   :  { %2712 = vmatpush3.bf16.msra.mxu0 %v3654_v31 }
0x1489   :  { %2713 = vmatprep.subr.bf16.mxu0 %v3177_v2 }
0x148c   :  { %2714 = vmatpush3.bf16.msra.mxu0 %v3660_v53 }
0x148d   :  { %2739 = vmatprep.subr.bf16.mxu0 %v3177_v2 }
0x152f   :  { %v1328_v33 = vpop.f32.mrf.mxu0 }
0x1530   :  { %v1334_v54 = vadd.f32 %v1328_v33, %v1292_v52 }
0x1531   :  { %v2677_v34 = vpop.f32.mrf.mxu0 }
0x1532   :  { %v1335_v55 = vmul.f32 %v1334_v54, %v3440_v63 }
0x1533   :  { %v1331_v56 = vpop.f32.mrf.mxu0 }
0x1534   :  { %2913 = vtanh.f32 %v1335_v55 }
0x1535   :  { %v2678_v57 = vpop.f32.mrf.mxu0 }
0x1541   :  { %v2914_v58 = vpop.eup %2913 }
0x1542   :  { %v1337_v59 = vmul.f32 %v2914_v58, %v3440_v63 }
0x1544   :  { %v1338_v24 = vadd.f32 %v1337_v59, %v3443_v5 }
0x1546   :  { %1339 = vrot.lane.b32.xlu0 %v1338_v24, %s3173_s3  ;;  %v1344_v62 = vmul.f32 %v1338_v24, %v1289_v23 }
0x15b8   :  { %v1340_v60 = vpop.permute.xlu0 %1339 }
0x15b9   :  { %v1341_v61 = vmul.f32 %v1340_v60, %v1338_v24 }
0x15bb   :  { %1342 = vrot.lane.b32.xlu1 %v1341_v61, %s3181_s30 }
0x162d   :  { %v1343_v0 = vpop.permute.xlu1 %1342 }
0x162e   :  { %v1345_v1 = vadd.f32 %v1344_v62, %v1343_v0  ;;  %v1516_v62 = vld [vmem:[#allocation2 + $0xc] sm:$0x3] }
0x1630   :  { %2915 = vtanh.f32 %v1345_v1 }
0x163d   :  { %v2916_v3 = vpop.eup %2915 }
0x163e   :  { %v1347_v4 = vmul.f32 %v2916_v3, %v1340_v60 }
0x1640   :  { %v1349_v6 = vpack.c.bf16 %v1347_v4, %v1347_v4 }
0x1642   :  { %2696 = vmatmul.mubr.bf16.vlgmr.msra.gmra.mxu1 %v1349_v6 }
0x1643   :  { %2720 = vmatpush3.bf16.msra.mxu1 %v3599_v40  ;;  %2735 = vmatprep.mubr.msk.bf16.mxu1 %vm3178_vm1, %v3177_v2 }
0x1644   :  { %2721 = vmatprep.subr.bf16.mxu1 %v3177_v2 }
0x1647   :  { %2722 = vmatpush3.bf16.msra.mxu1 %v3614_v46 }
0x1648   :  { %2723 = vmatprep.subr.bf16.mxu1 %v3177_v2 }
0x164b   :  { %2724 = vmatpush3.bf16.msra.mxu1 %v3622_v48 }
0x164c   :  { %2725 = vmatprep.subr.bf16.mxu1 %v3177_v2 }
0x164f   :  { %2726 = vmatpush3.bf16.msra.mxu1 %v3628_v50 }
0x1650   :  { %2727 = vmatprep.subr.bf16.mxu1 %v3177_v2 }
0x1653   :  { %2728 = vmatpush3.bf16.msra.mxu1 %v3638_v26 }
0x1654   :  { %2729 = vmatprep.subr.bf16.mxu1 %v3177_v2 }
0x1657   :  { %2730 = vmatpush3.bf16.msra.mxu1 %v3646_v51 }
0x1658   :  { %2731 = vmatprep.subr.bf16.mxu1 %v3177_v2 }
0x165b   :  { %2732 = vmatpush3.bf16.msra.mxu1 %v3654_v31 }
0x165c   :  { %2733 = vmatprep.subr.bf16.mxu1 %v3177_v2 }
0x165f   :  { %2734 = vmatpush3.bf16.msra.mxu1 %v3660_v53 }
0x1660   :  { %2759 = vmatprep.subr.bf16.mxu1 %v3177_v2 }
0x1702   :  { %v1384_v8 = vpop.f32.mrf.mxu1 }
0x1703   :  { %v1390_v9 = vadd.f32 %v1384_v8, %v1348_v7 }
0x1704   :  { %v2697_v10 = vpop.f32.mrf.mxu1 }
0x1705   :  { %v1391_v11 = vmul.f32 %v1390_v9, %v3440_v63 }
0x1706   :  { %v1387_v12 = vpop.f32.mrf.mxu1 }
0x1707   :  { %2917 = vtanh.f32 %v1391_v11 }
0x1708   :  { %v2698_v13 = vpop.f32.mrf.mxu1 }
0x1709   :  { %v3830_v13 = vld [vmem:[#allocation3] sm:$0x3] }
0x1714   :  { %v2918_v14 = vpop.eup %2917 }
0x1715   :  { %v1393_v15 = vmul.f32 %v2918_v14, %v3440_v63  ;;  %v3182_v14 = vmov 4  }
0x1716   :  { %2827 = vset.pattern.permute.xlu0 %v3182_v14 }
0x1717   :  { %v1394_v16 = vadd.f32 %v1393_v15, %v3443_v5 }
0x1719   :  { %1395 = vrot.lane.b32.xlu0 %v1394_v16, %s3173_s3  ;;  %v1400_v19 = vmul.f32 %v1394_v16, %v1345_v1 }
0x178b   :  { %v1396_v17 = vpop.permute.xlu0 %1395 }
0x178c   :  { %v1397_v18 = vmul.f32 %v1396_v17, %v1394_v16 }
0x178e   :  { %1398 = vrot.lane.b32.xlu1 %v1397_v18, %s3181_s30 }
0x1800   :  { %v1399_v20 = vpop.permute.xlu1 %1398 }
0x1801   :  { %v1401_v21 = vadd.f32 %v1400_v19, %v1399_v20 }
0x1803   :  { %2919 = vtanh.f32 %v1401_v21 }
0x1810   :  { %v2920_v22 = vpop.eup %2919 }
0x1811   :  { %v1403_v28 = vmul.f32 %v2920_v22, %v1396_v17 }
0x1813   :  { %v1405_v30 = vpack.c.bf16 %v1403_v28, %v1403_v28 }
0x1815   :  { %2716 = vmatmul.mubr.bf16.vlgmr.msra.gmra.mxu0 %v1405_v30 }
0x1816   :  { %2740 = vmatpush3.bf16.msra.mxu0 %v3599_v40  ;;  %2755 = vmatprep.mubr.msk.bf16.mxu0 %vm3178_vm1, %v3177_v2 }
0x1817   :  { %2741 = vmatprep.subr.bf16.mxu0 %v3177_v2 }
0x181a   :  { %2742 = vmatpush3.bf16.msra.mxu0 %v3614_v46 }
0x181b   :  { %2743 = vmatprep.subr.bf16.mxu0 %v3177_v2 }
0x181e   :  { %2744 = vmatpush3.bf16.msra.mxu0 %v3622_v48 }
0x181f   :  { %2745 = vmatprep.subr.bf16.mxu0 %v3177_v2 }
0x1822   :  { %2746 = vmatpush3.bf16.msra.mxu0 %v3628_v50 }
0x1823   :  { %2747 = vmatprep.subr.bf16.mxu0 %v3177_v2 }
0x1826   :  { %2748 = vmatpush3.bf16.msra.mxu0 %v3638_v26 }
0x1827   :  { %2749 = vmatprep.subr.bf16.mxu0 %v3177_v2 }
0x182a   :  { %2750 = vmatpush3.bf16.msra.mxu0 %v3646_v51 }
0x182b   :  { %2751 = vmatprep.subr.bf16.mxu0 %v3177_v2 }
0x182e   :  { %2752 = vmatpush3.bf16.msra.mxu0 %v3654_v31 }
0x182f   :  { %2753 = vmatprep.subr.bf16.mxu0 %v3177_v2 }
0x1832   :  { %2754 = vmatpush3.bf16.msra.mxu0 %v3660_v53 }
0x1833   :  { %1947 = vmatprep.subr.bf16.mxu0 %v3179_v35 }
0x18d5   :  { %v1440_v36 = vpop.f32.mrf.mxu0 }
0x18d6   :  { %v1446_v37 = vadd.f32 %v1440_v36, %v1404_v32 }
0x18d7   :  { %v2717_v38 = vpop.f32.mrf.mxu0 }
0x18d8   :  { %v1447_v39 = vmul.f32 %v1446_v37, %v3440_v63 }
0x18d9   :  { %v1443_v41 = vpop.f32.mrf.mxu0 }
0x18da   :  { %2921 = vtanh.f32 %v1447_v39 }
0x18db   :  { %v2718_v42 = vpop.f32.mrf.mxu0 }
0x18e7   :  { %v2922_v43 = vpop.eup %2921 }
0x18e8   :  { %v1449_v44 = vmul.f32 %v2922_v43, %v3440_v63  ;;  %v3183_v43 = vmov 2102212464  }
0x18ea   :  { %v1450_v45 = vadd.f32 %v1449_v44, %v3443_v5 }
0x18ec   :  { %1451 = vrot.lane.b32.xlu0 %v1450_v45, %s3173_s3  ;;  %v1456_v23 = vmul.f32 %v1450_v45, %v1401_v21  ;;  %v2210_v21 = vld [vmem:[%s3947_s12] ss:$0 sm:$0xff] }
0x195e   :  { %v1452_v47 = vpop.permute.xlu0 %1451 }
0x195f   :  { %v1453_v49 = vmul.f32 %v1452_v47, %v1450_v45  ;;  %v3184_v45 = vmov 920167782  }
0x1961   :  { %1454 = vrot.lane.b32.xlu1 %v1453_v49, %s3181_s30 }
0x19d3   :  { %v1455_v25 = vpop.permute.xlu1 %1454 }
0x19d4   :  { %v1457_v27 = vadd.f32 %v1456_v23, %v1455_v25  ;;  %v3185_v23 = vmov 1326507024  }
0x19d6   :  { %2923 = vtanh.f32 %v1457_v27 }
0x19e3   :  { %v2924_v29 = vpop.eup %2923 }
0x19e4   :  { %v1459_v52 = vmul.f32 %v2924_v29, %v1452_v47 }
0x19e6   :  { %v1461_v33 = vpack.c.bf16 %v1459_v52, %v1459_v52 }
0x19e8   :  { %2736 = vmatmul.mubr.bf16.vlgmr.msra.gmra.mxu1 %v1461_v33 }
0x19e9   :  { %2760 = vmatpush3.bf16.msra.mxu1 %v3599_v40  ;;  %2775 = vmatprep.mubr.msk.bf16.mxu1 %vm3178_vm1, %v3177_v2  ;;  %v1460_v40 = vld [vmem:[#allocation2 + $0xa] sm:$0x3] }
0x19ea   :  { %2761 = vmatprep.subr.bf16.mxu1 %v3177_v2 }
0x19ed   :  { %2762 = vmatpush3.bf16.msra.mxu1 %v3614_v46 }
0x19ee   :  { %2763 = vmatprep.subr.bf16.mxu1 %v3177_v2 }
0x19f1   :  { %2764 = vmatpush3.bf16.msra.mxu1 %v3622_v48 }
0x19f2   :  { %2765 = vmatprep.subr.bf16.mxu1 %v3177_v2 }
0x19f5   :  { %2766 = vmatpush3.bf16.msra.mxu1 %v3628_v50 }
0x19f6   :  { %2767 = vmatprep.subr.bf16.mxu1 %v3177_v2 }
0x19f9   :  { %2768 = vmatpush3.bf16.msra.mxu1 %v3638_v26 }
0x19fa   :  { %2769 = vmatprep.subr.bf16.mxu1 %v3177_v2 }
0x19fd   :  { %2770 = vmatpush3.bf16.msra.mxu1 %v3646_v51 }
0x19fe   :  { %2771 = vmatprep.subr.bf16.mxu1 %v3177_v2 }
0x1a01   :  { %2772 = vmatpush3.bf16.msra.mxu1 %v3654_v31 }
0x1a02   :  { %2773 = vmatprep.subr.bf16.mxu1 %v3177_v2 }
0x1a05   :  { %2774 = vmatpush3.bf16.msra.mxu1 %v3660_v53 }
0x1a06   :  { %2779 = vmatprep.subr.bf16.mxu1 %v3177_v2 }
0x1aa8   :  { %v1496_v46 = vpop.f32.mrf.mxu1 }
0x1aa9   :  { %v1502_v48 = vadd.f32 %v1496_v46, %v1460_v40  ;;  %v3186_v40 = vmov 683565275  }
0x1aaa   :  { %v2737_v50 = vpop.f32.mrf.mxu1 }
0x1aab   :  { %v1503_v26 = vmul.f32 %v1502_v48, %v3440_v63  ;;  %v3187_v48 = vmov 2475754826  }
0x1aac   :  { %v1499_v54 = vpop.f32.mrf.mxu1 }
0x1aad   :  { %2925 = vtanh.f32 %v1503_v26  ;;  %v3188_v54 = vmov 2131351028  }
0x1aae   :  { %v2738_v34 = vpop.f32.mrf.mxu1 }
0x1aba   :  { %v2926_v51 = vpop.eup %2925 }
0x1abb   :  { %v1505_v55 = vmul.f32 %v2926_v51, %v3440_v63 }
0x1abd   :  { %v1506_v31 = vadd.f32 %v1505_v55, %v3443_v5 }
0x1abf   :  { %1507 = vrot.lane.b32.xlu0 %v1506_v31, %s3173_s3  ;;  %v1512_v57 = vmul.f32 %v1506_v31, %v1457_v27 }
0x1b31   :  { %v1508_v56 = vpop.permute.xlu0 %1507 }
0x1b32   :  { %v1509_v53 = vmul.f32 %v1508_v56, %v1506_v31 }
0x1b34   :  { %1510 = vrot.lane.b32.xlu1 %v1509_v53, %s3181_s30 }
0x1ba6   :  { %v1511_v58 = vpop.permute.xlu1 %1510 }
0x1ba7   :  { %v1513_v59 = vadd.f32 %v1512_v57, %v1511_v58 }
0x1ba9   :  { %2927 = vtanh.f32 %v1513_v59 }
0x1bb6   :  { %v2928_v24 = vpop.eup %2927 }
0x1bb7   :  { %v1515_v60 = vmul.f32 %v2928_v24, %v1508_v56 }
0x1bb9   :  { %v1517_v61 = vpack.c.bf16 %v1515_v60, %v1515_v60 }
0x1bbb   :  { %2756 = vmatmul.mubr.bf16.vlgmr.msra.gmra.mxu0 %v1517_v61 }
0x1c7b   :  { %v1552_v0 = vpop.f32.mrf.mxu0 }
0x1c7c   :  { %v1558_v1 = vadd.f32 %v1552_v0, %v1516_v62 }
0x1c7d   :  { %v2757_v3 = vpop.f32.mrf.mxu0 }
0x1c7e   :  { %v1559_v4 = vmul.f32 %v1558_v1, %v3440_v63 }
0x1c7f   :  { %v1555_v6 = vpop.f32.mrf.mxu0 }
0x1c80   :  { %2929 = vtanh.f32 %v1559_v4 }
0x1c81   :  { %v2758_v7 = vpop.f32.mrf.mxu0 }
0x1c8d   :  { %v2930_v8 = vpop.eup %2929 }
0x1c8e   :  { %v1561_v9 = vmul.f32 %v2930_v8, %v3440_v63 }
0x1c90   :  { %v1562_v10 = vadd.f32 %v1561_v9, %v3443_v5 }
0x1c92   :  { %1563 = vrot.lane.b32.xlu0 %v1562_v10, %s3173_s3  ;;  %v1568_v15 = vmul.f32 %v1562_v10, %v1513_v59 }
0x1c96   :  { %1632 = vperm.xlu0 %2827, %v3830_v13  }
0x1d04   :  { %v1564_v11 = vpop.permute.xlu0 %1563 }
0x1d05   :  { %v1565_v12 = vmul.f32 %v1564_v11, %v1562_v10 }
0x1d07   :  { %1566 = vrot.lane.b32.xlu1 %v1565_v12, %s3181_s30 }
0x1d11   :  { %v1633_v22 = vpop.permute.xlu0 %1632 }
0x1d12   :  { %v3841_v28 = vmul.f32 %v2210_v21, %v1633_v22 }
0x1d14   :  { %v1645_v30 = vand.u32 2139095040, %v3841_v28  ;;  %v1642_v52 = vand.u32 2147483647, %v3841_v28  ;;  %vm1644_vm6 = vcmp.lt.s32.totalorder %v3841_v28, 0 }
0x1d16   :  { %v1646_v32 = vshrl.u32 %v1645_v30, 23  ;;  %v1649_v33 = vand.u32 8388607, %v1642_v52  ;;  %vm1643_vm7 = vcmp.le.f32.partialorder %v1642_v52, 0.7853982 }
0x1d18   :  { %v2211_v36 = vadd.s32 4294967169, %v1646_v32  ;;  %v1650_v53 = vor.u32 8388608, %v1649_v33 }
0x1d1a   :  { %v1652_v37 = vadd.s32 1, %v2211_v36  ;;  %v1690_v24 = vshll.u32 %v1650_v53, 8 }
0x1d1c   :  { %vm1653_vm13 = vcmp.gt.s32.totalorder %v1652_v37, 0 }
0x1d1d   :  { %v1654_v38 = vsel %vm1653_vm13, %v1652_v37, 0 }
0x1d1e   :  { %v1656_v39 = vand.u32 31, %v1654_v38  ;;  %v1655_v42 = vshrl.u32 %v1654_v38, 5 }
0x1d20   :  { %v1657_v41 = vsub.s32 32, %v1656_v39  ;;  %v1668_v44 = vshll.u32 %v3183_v43, %v1656_v39  ;;  %v1671_v49 = vshll.u32 %v3184_v45, %v1656_v39  ;;  %vm1677_vm14 = vcmp.lt.s32.totalorder %v1655_v42, 4 }
0x1d21   :  { %v1659_v46 = vshll.u32 %v3186_v40, %v1656_v39  ;;  %v1662_v26 = vshll.u32 %v3187_v48, %v1656_v39  ;;  %v1665_v51 = vshll.u32 %v3188_v54, %v1656_v39  ;;  %vm1674_vm15 = vcmp.lt.s32.totalorder %v1655_v42, 1 }
0x1d22   :  { %v1669_v47 = vshrl.u32 %v3184_v45, %v1657_v41  ;;  %v1672_v25 = vshrl.u32 %v3185_v23, %v1657_v41  ;;  %v1660_v50 = vshrl.u32 %v3187_v48, %v1657_v41  ;;  %v1663_v34 = vshrl.u32 %v3188_v54, %v1657_v41 }
0x1d23   :  { %v1666_v55 = vshrl.u32 %v3183_v43, %v1657_v41  ;;  %vm1676_vm0 = vcmp.lt.s32.totalorder %v1655_v42, 3  ;;  %vm1675_vm3 = vcmp.lt.s32.totalorder %v1655_v42, 2  ;;  %v1658_v4 = vshrl.u32 %v3186_v40, %v1657_v41 }
0x1d24   :  { %v1670_v27 = vor.u32 %v1669_v47, %v1668_v44  ;;  %v1673_v29 = vor.u32 %v1672_v25, %v1671_v49  ;;  %v1661_v57 = vor.u32 %v1660_v50, %v1659_v46  ;;  %v1664_v58 = vor.u32 %v1663_v34, %v1662_v26 }
0x1d25   :  { %v1667_v59 = vor.u32 %v1666_v55, %v1665_v51 }
0x1d26   :  { %v1683_v31 = vsel %vm1677_vm14, %v1670_v27, 920167782  ;;  %v1687_v56 = vsel %vm1677_vm14, %v1673_v29, 1326507024  ;;  %v1682_v60 = vsel %vm1674_vm15, %v1661_v57, %v1664_v58 }
0x1d27   :  { %v1684_v61 = vsel %vm1676_vm0, %v1667_v59, %v1683_v31  ;;  %v1686_v62 = vsel %vm1674_vm15, %v1664_v58, %v1667_v59  ;;  %v1688_v0 = vsel %vm1676_vm0, %v1670_v27, %v1687_v56  ;;  %v1679_v8 = vsel %vm1677_vm14, %v1667_v59, 2102212464 }
0x1d28   :  { %v1685_v1 = vsel %vm1675_vm3, %v1682_v60, %v1684_v61  ;;  %v1689_v3 = vsel %vm1675_vm3, %v1686_v62, %v1688_v0  ;;  %v1680_v12 = vsel %vm1676_vm0, %v1664_v58, %v1679_v8  ;;  %vm1858_vm0 = vcmask 64512  }
0x1d29   :  { %v3849_v6 = vmul.u32.u64.low %v1690_v24, %v1689_v3  ;;  %v3850_v7 = vmul.u32.u64.high %v1690_v24, %v1689_v3, %v3849_v6  ;;  %v3853_v9 = vmul.u32.u64.low %v1690_v24, %v1685_v1  ;;  %v3854_v10 = vmul.u32.u64.high %v1690_v24, %v1685_v1, %v3853_v9  ;;  %v1572_v1 = vld [vmem:[#allocation2 + $0xe] sm:$0x3] }
0x1d2b   :  { %vm1699_vm4 = vc.u32 %v3850_v7, %v3853_v9  ;;  %v1698_v39 = vadd.s32 %v3853_v9, %v3850_v7 }
0x1d79   :  { %v1567_v16 = vpop.permute.xlu1 %1566 }
0x1d7a   :  { %v3833_v17 = vadd.f32 %v1568_v15, %v1567_v16  ;;  %v1700_v16 = vadd.s32 1, %v3854_v10 }
0x1d7c   :  { %2931 = vtanh.f32 %v3833_v17 }
0x1d89   :  { %v2932_v18 = vpop.eup %2931 }
0x1d8a   :  { %v1571_v19 = vmul.f32 %v2932_v18, %v1564_v11  ;;  %v1678_v11 = vsel %vm1674_vm15, %v1658_v4, %v1661_v57  ;;  %v1701_v18 = vsel %vm1699_vm4, %v1700_v16, %v3854_v10  ;;  %vm1734_vm15 = vweird.f32 %v3841_v28  ;;  %v2863_v16 = vld [vmem:[%s3948_s13 + $0x20] sm:$0xff]  }
0x1d8b   :  { %v1681_v14 = vsel %vm1675_vm3, %v1678_v11, %v1680_v12  ;;  %v2861_v11 = vld [vmem:[%s3948_s13 + $0x30] sm:$0xff]   ;;  %vm1940_vm3 = vcmask 97280   ;;  %vm2130_vm4 = vcmask 58368  }
0x1d8c   :  { %v1573_v20 = vpack.c.bf16 %v1571_v19, %v1571_v19  ;;  %v1697_v15 = vmul.u32 %v1690_v24, %v1681_v14 }
0x1d8e   :  { %2776 = vmatmul.mubr.bf16.vlgmr.msra.gmra.mxu1 %v1573_v20  ;;  %v1702_v19 = vadd.s32 %v1701_v18, %v1697_v15  ;;  %v2862_v15 = vld [vmem:[%s3948_s13 + $0x28] sm:$0xff]  }
0x1d8f   :  { %2783 = vmatprep.mubr.msk.bf16.mxu1 %vm3178_vm1, %v3177_v2  ;;  %v2866_v18 = vld [vmem:[%s3948_s13 + $0x8] sm:$0xff]  }
0x1d90   :  { %v1703_v20 = vadd.s32 536870912, %v1702_v19 }
0x1d92   :  { %v1704_v21 = vshrl.u32 %v1703_v20, 30  ;;  %v2867_v20 = vld [vmem:[%s3948_s13] sm:$0xff]  }
0x1d94   :  { %v1705_v22 = vshll.u32 %v1704_v21, 30  ;;  %v1728_v40 = vsub.s32 4, %v1704_v21 }
0x1d96   :  { %v1706_v30 = vsub.s32 %v1702_v19, %v1705_v22  ;;  %v1729_v50 = vsel %vm1644_vm6, %v1728_v40, %v1704_v21  ;;  %v2868_v22 = vld [vmem:[%s3948_s13 + $0x40] sm:$0x3f]  }
0x1d97   :  { %v1731_v54 = vsel %vm1643_vm7, 0, %v1729_v50  ;;  %v2871_v50 = vld [vmem:[%s3952_s17 + $0x8] sm:$0xff]  }
0x1d98   :  { %v1708_v32 = vsub.s32 0, %v1706_v30  ;;  %v1735_v34 = vadd.s32 3, %v1731_v54  ;;  %v1839_v55 = vand.u32 3, %v1731_v54  ;;  %v2230_v54 = vld [vmem:[%s3951_s16] ss:$0 sm:$0xff] }
0x1d9a   :  { %v2212_v36 = vmin.u32 %v1708_v32, %v1706_v30  ;;  %v1736_v51 = vand.u32 3, %v1735_v34  ;;  %vm1844_vm9 = vcmp.eq.s32.totalorder %v1839_v55, 2  ;;  %vm1841_vm11 = vcmp.eq.s32.totalorder %v1839_v55, 0 }
0x1d9b   :  { %vm1840_vm14 = vcmp.lt.s32.totalorder %v1839_v55, 2 }
0x1d9c   :  { %v1710_v37 = vclz %v2212_v36  ;;  %vm1741_vm8 = vcmp.eq.s32.totalorder %v1736_v51, 2  ;;  %vm1738_vm10 = vcmp.eq.s32.totalorder %v1736_v51, 0  ;;  %vm1737_vm13 = vcmp.lt.s32.totalorder %v1736_v51, 2 }
0x1d9d   :  { %v2060_v51 = vstv %s2154_s27 }
0x1d9e   :  { %v2213_v38 = vadd.s32 4294967294, %v1710_v37 }
0x1da0   :  { %vm2214_vm5 = vcmp.lt.s32.totalorder %v2213_v38, 0 }
0x1da1   :  { %v1713_v41 = vsel %vm2214_vm5, 0, %v2213_v38 }
0x1da2   :  { %v1714_v42 = vsub.s32 32, %v1713_v41  ;;  %v1715_v43 = vshll.u32 %v1706_v30, %v1713_v41  ;;  %v1718_v44 = vsub.s32 4294967266, %v1713_v41  ;;  %v1945_v30 = vsel %vm988_vm12, %v2868_v22, 0 }
0x1da4   :  { %v1716_v45 = vshrl.u32 %v1698_v39, %v1714_v42  ;;  %v1719_v47 = vadd.s32 127, %v1718_v44 }
0x1da6   :  { %v1717_v49 = vor.u32 %v1716_v45, %v1715_v43  ;;  %v1720_v23 = vshll.u32 %v1719_v47, 23  ;;  %v2870_v47 = vld [vmem:[#allocation19] sm:$0xff]  }
0x1da8   :  { %v1721_v25 = vor.u32 4788187, %v1720_v23  ;;  %v1724_v27 = vcvt.s32.f32 %v1717_v49 }
0x1daa   :  { %v1722_v29 = vand.u32 2147483647, %v1721_v25 }
0x1dac   :  { %v1725_v33 = vmul.f32 %v1724_v27, %v1722_v29 }
0x1dae   :  { %v1726_v46 = vxor.u32 2147483648, %v1725_v33 }
0x1db0   :  { %v1727_v48 = vsel %vm1644_vm6, %v1726_v46, %v1725_v33 }
0x1db1   :  { %v1730_v26 = vsel %vm1643_vm7, %v3841_v28, %v1727_v48  ;;  %v2860_v28 = vld [vmem:[%s3948_s13 + $0x38] sm:$0xff]  }
0x1db2   :  { %2933 = vcosq.f32 %v1730_v26  ;;  %1948 = vmatpush1.bf16.msra.mxu0 %v2860_v28 }
0x1db3   :  { %2935 = vsinq.f32 %v1730_v26  ;;  %1949 = vmatprep.subr.bf16.mxu0 %v3179_v35  ;;  %v2872_v26 = vld [vmem:[%s3952_s17] sm:$0xff]  }
0x1db6   :  { %1950 = vmatpush1.bf16.msra.mxu0 %v2861_v11 }
0x1db7   :  { %1951 = vmatprep.subr.bf16.mxu0 %v3179_v35 }
0x1dba   :  { %1952 = vmatpush1.bf16.msra.mxu0 %v2862_v15 }
0x1dbb   :  { %1953 = vmatprep.subr.bf16.mxu0 %v3179_v35 }
0x1dbe   :  { %1954 = vmatpush1.bf16.msra.mxu0 %v2863_v16 }
0x1dbf   :  { %v2934_v31 = vpop.eup %2933  ;;  %1955 = vmatprep.subr.bf16.mxu0 %v3179_v35 }
0x1dc0   :  { %v2936_v56 = vpop.eup %2935  ;;  %v1742_v53 = vxor.u32 2147483648, %v2934_v31 }
0x1dc1   :  { %v1739_v52 = vxor.u32 2147483648, %v2936_v56 }
0x1dc2   :  { %v1743_v57 = vsel %vm1741_vm8, %v1742_v53, %v2936_v56  ;;  %v1846_v58 = vsel %vm1844_vm9, %v1742_v53, %v2936_v56 }
0x1dc3   :  { %v1740_v59 = vsel %vm1738_vm10, %v2934_v31, %v1739_v52  ;;  %v1843_v24 = vsel %vm1841_vm11, %v2934_v31, %v1739_v52 }
0x1dc4   :  { %v1744_v60 = vsel %vm1737_vm13, %v1740_v59, %v1743_v57  ;;  %v1847_v61 = vsel %vm1840_vm14, %v1843_v24, %v1846_v58  ;;  %v2234_v58 = vld [vmem:[%s3953_s18] ss:$0 sm:$0xff] }
0x1dc5   :  { %v1745_v62 = vsel %vm1734_vm15, nan, %v1744_v60  ;;  %v1848_v0 = vsel %vm1734_vm15, nan, %v1847_v61 }
0x1dc6   :  { %1850 = vrot.lane.b32.xlu0 %v1745_v62, %s3174_s26  ;;  %s2138_s26 = sshll.u32 %s3190_s5, 4  ;;  %s2139_s26 = int_to_ptr.vmem [resolvable:$true] %s2138_s26 }
0x1dc7   :  { %s3129_s16 = scalar_lea.vmem %s2139_s26, 32  ;;  %p3134_p4 = scmp.lt.s32.totalorder %s2139_s26, %s2139_s26 }
0x1dc8   :  { %p3130_p3 = scmp.ne.s32.totalorder %s2139_s26, %s3129_s16  ;;  %p3135_p5 = scmp.lt.s32.totalorder %s3129_s16, %s3129_s16 }
0x1dca   :  { %p3136_p6 = por %p3135_p5, %p3134_p4 }
0x1dcc   :  { %p3137_p7 = pnand %p3136_p6, %p3130_p3 }
0x1e38   :  { %v1851_v37 = vpop.permute.xlu0 %1850 }
0x1e39   :  { %v1857_v39 = vsel %vm202_vm2, %v3830_v13, %v1851_v37  ;;  %v2219_v13 = vld [vmem:[%s3949_s14] ss:$0 sm:$0xff] }
0x1e4e   :  { %v1608_v3 = vpop.f32.mrf.mxu1 }
0x1e4f   :  { %v1614_v4 = vadd.f32 %v1608_v3, %v1572_v1 }
0x1e50   :  { %v2777_v6 = vpop.f32.mrf.mxu1 }
0x1e51   :  { %v1615_v7 = vmul.f32 %v1614_v4, %v3440_v63 }
0x1e52   :  { %v1611_v8 = vpop.f32.mrf.mxu1 }
0x1e53   :  { %2937 = vtanh.f32 %v1615_v7 }
0x1e54   :  { %v2778_v9 = vpop.f32.mrf.mxu1 }
0x1e60   :  { %v2938_v10 = vpop.eup %2937 }
0x1e61   :  { %v1617_v12 = vmul.f32 %v2938_v10, %v3440_v63  ;;  %v2864_v63 = vld [vmem:[%s3948_s13 + $0x18] sm:$0xff]  }
0x1e62   :  { %1956 = vmatpush1.bf16.msra.mxu0 %v2864_v63 }
0x1e63   :  { %v1618_v14 = vadd.f32 %v1617_v12, %v3443_v5  ;;  %1957 = vmatprep.subr.bf16.mxu0 %v3179_v35  ;;  %v2865_v5 = vld [vmem:[%s3948_s13 + $0x10] sm:$0xff]   ;;  %s2153_s13 = sld [smem:[#allocation7 + $0x2]] }
0x1e65   :  { %1619 = vrot.lane.b32.xlu1 %v1618_v14, %s3173_s3  ;;  %v1624_v32 = vmul.f32 %v1618_v14, %v3833_v17  ;;  %v2869_v17 = vld [vmem:[#allocation19 + $0x8] sm:$0xff]  }
0x1e66   :  { %1958 = vmatpush1.bf16.msra.mxu0 %v2865_v5  ;;  %2780 = vmatpush3.bf16.msra.mxu1 %v2869_v17 }
0x1e67   :  { %1959 = vmatprep.subr.bf16.mxu0 %v3179_v35  ;;  %2781 = vmatprep.subr.bf16.mxu1 %v3177_v2 }
0x1e69   :  { %v1988_v23 = vstv %s2153_s13 }
0x1e6a   :  { %1960 = vmatpush1.bf16.msra.mxu0 %v2866_v18  ;;  %2782 = vmatpush3.bf16.msra.mxu1 %v2870_v47 }
0x1e6b   :  { %1961 = vmatprep.subr.bf16.mxu0 %v3179_v35 }
0x1e6e   :  { %1962 = vmatpush1.bf16.msra.mxu0 %v2867_v20 }
0x1e6f   :  { %1977 = vmatprep.subr.bf16.mxu0 %v3179_v35 }
0x1e72   :  { %1978 = vmatpush2.bf16.msra.mxu0 %v1945_v30 }
0x1e73   :  { %2787 = vmatprep.subr.bf16.mxu0 %v3177_v2 }
0x1ed7   :  { %v1620_v19 = vpop.permute.xlu1 %1619 }
0x1ed8   :  { %v1621_v21 = vmul.f32 %v1620_v19, %v1618_v14 }
0x1eda   :  { %1622 = vrot.lane.b32.xlu1 %v1621_v21, %s3181_s30 }
0x1ede   :  { %1854 = vrot.lane.b32.xlu1 %v1848_v0, %s3189_s25 }
0x1f4c   :  { %v1623_v36 = vpop.permute.xlu1 %1622 }
0x1f4d   :  { %v1625_v38 = vadd.f32 %v1624_v32, %v1623_v36 }
0x1f4f   :  { %2939 = vtanh.f32 %v1625_v38 }
0x1f50   :  { %v1855_v41 = vpop.permute.xlu1 %1854 }
0x1f51   :  { %v1859_v42 = vsel %vm1858_vm0, %v1857_v39, %v1855_v41 }
0x1f52   :  { %v1879_v35 = vpack.c.bf16 %v1859_v42, %v1859_v42 }
0x1f54   :  { %2229 = vmatprep.mubr.msk.bf16.mxu0 %vm1940_vm3, %v1879_v35 }
0x1f5c   :  { %v2940_v43 = vpop.eup %2939 }
0x1f5d   :  { %v1627_v44 = vmul.f32 %v2940_v43, %v1620_v19 }
0x1f5f   :  { %v1878_v45 = vpack.c.bf16 %v1627_v44, %v1627_v44 }
0x1f61   :  { %1980 = vmatmul.mubr.bf16.vlgmr.msra.gmra.mxu0 %v1878_v45 }
0x1f62   :  { %2791 = vmatprep.mubr.msk.bf16.mxu0 %vm3178_vm1, %v3177_v2  ;;  %vm2015_vm1 = vcmask 261120   ;;  %2788 = vmatpush3.bf16.msra.mxu0 %v2871_v50 }
0x1f63   :  { %2789 = vmatprep.subr.bf16.mxu0 %v3177_v2 }
0x1f66   :  { %2790 = vmatpush3.bf16.msra.mxu0 %v2872_v26 }
0x2021   :  { %v1981_v49 = vpop.f32.mrf.mxu0 }
0x2022   :  { %v1982_v25 = vadd.f32 %v2219_v13, %v1981_v49 }
0x2023   :  { %v1983_v27 = vpop.f32.mrf.mxu0 }
0x2024   :  { %vm1987_vm2 = vcmp.ge.f32.partialorder %v1982_v25, 0.0  ;;  %v1989_v29 = vmul.f32 %v1988_v23, %v1982_v25 }
0x2025   :  { %v1984_v33 = vpop.f32.mrf.mxu0 }
0x2026   :  { %v1990_v40 = vsel %vm1987_vm2, %v1982_v25, %v1989_v29 }
0x2027   :  { %v1995_v46 = vpack.c.bf16 %v1990_v40, %v1990_v40  ;;  %v1985_v48 = vpop.f32.mrf.mxu0 }
0x2029   :  { %2784 = vmatmul.mubr.msk.bf16.vlgmr.msra.gmra.mxu1 %vm2015_vm1, %v1995_v46 }
0x20e9   :  { %v2053_v34 = vpop.f32.mrf.mxu1 }
0x20ea   :  { %v2054_v55 = vadd.f32 %v2230_v54, %v2053_v34 }
0x20eb   :  { %v2785_v31 = vpop.f32.mrf.mxu1 }
0x20ec   :  { %vm2059_vm12 = vcmp.ge.f32.partialorder %v2054_v55, 0.0  ;;  %v2061_v56 = vmul.f32 %v2060_v51, %v2054_v55 }
0x20ed   :  { %v2056_v53 = vpop.f32.mrf.mxu1 }
0x20ee   :  { %v2062_v52 = vsel %vm2059_vm12, %v2054_v55, %v2061_v56 }
0x20ef   :  { %v2067_v57 = vpack.c.bf16 %v2062_v52, %v2062_v52  ;;  %v2786_v2 = vpop.f32.mrf.mxu1 }
0x20f1   :  { %2792 = vmatmul.mubr.msk.bf16.vlgmr.msra.gmra.mxu0 %vm2015_vm1, %v2067_v57 }
0x21b1   :  { %v2124_v59 = vpop.f32.mrf.mxu0 }
0x21b2   :  { %v2125_v24 = vadd.f32 %v2234_v58, %v2124_v59 }
0x21b3   :  { %v2793_v60 = vpop.f32.mrf.mxu0 }
0x21b4   :  { %2131 = vst.msk [vmem:[#allocation20] sm:$0x3] %vm2130_vm4, %v2125_v24 }
0x21b5   :  { %v2127_v61 = vpop.f32.mrf.mxu0 }
0x21b6   :  { %3140 = shalt.err (!%p3137_p7)
}
0x21b7   :  { %2141 = dma.vmem_to_hbm [thread:$0]  %s2139_s26, 32, %s3954_s19, [#allocation5]   ;;  %v2794_v62 = vpop.f32.mrf.mxu0 }
0x21b8   :  { %3161 = dma.done.wait [#allocation5], 32  }
0x21b9   :  { %3162 = vsyncadd [#allocation5], 4294967264 }
0x21ba   :  { %2145 = vsyncpa [#allocation4], 1 }
0x21bb   :  { %2146 = vsyncpa [#allocation9], 1 }
0x21bc   :  { %2147 = vsyncpa [#allocation12], 1 }
0x21bd   :  { %2148 = vsyncpa [#allocation15], 1 }
0x21be   :  { %2149 = vsyncpa [#allocation18], 1 }
0x21bf   :  { %2150 = vsyncpa [#allocation5], 1 }
0x21c0   :  { %2151 = vsyncpa [#allocation6], 1 }

</bundles_post_ra>
